<compile_context>
chip_gen: v5e
topology: v5e:2x2
jax: 0.10.0
libtpu: 0.0.40
codegen_flags: <defaults>
</compile_context>

<pallas_src>
import jax
import jax.numpy as jnp
from jax.experimental import pallas as pl
from jax.experimental.pallas import tpu as pltpu

BN_EPS = 1e-5
EXPANSION = 1                # PreActivationBlock.EXPANSION
ACT_DTYPE = jnp.bfloat16     # inter-layer activation storage dtype
MXU_DTYPE = jnp.bfloat16     # matmul operand dtype (f32 accumulation)
LANE_PAD = 128               # pad narrow channel dims up to one full vreg lane


# ----------------------------- tiling helper ---------------------------------

def _pick_tile(dim, cap, align):
    """Largest tile <= cap that divides `dim` and is a multiple of `align`,
    falling back to the whole dim (always a legal block)."""
    if dim <= cap:
        return dim
    t = (cap // align) * align
    while t >= align:
        if dim % t == 0:
            return t
        t -= align
    return dim


# ----------------------------- matmul kernels (MXU) ---------------------------

def _make_mm_kernel(multi_k, has_residual, has_affine, dual):
    """Tiled matmul kernel with a fused epilogue.

    Epilogue variants:
      plain            : out = A@B
      affine (+relu)   : out = relu(scale * (A@B) + shift)      (folded BN)
      residual         : out = A@B + res
      dual (+residual) : raw = A@B (+ res);  pre = relu(scale*raw + shift)
    Single-K-step variant writes straight to the output (no f32 scratch);
    the multi-K variant accumulates in a VMEM f32 scratch.
    """

    def kernel(*refs):
        idx = 0
        a_ref = refs[idx]; idx += 1
        b_ref = refs[idx]; idx += 1
        res_ref = None
        if has_residual:
            res_ref = refs[idx]; idx += 1
        s_ref = t_ref = None
        if has_affine:
            s_ref = refs[idx]; t_ref = refs[idx + 1]; idx += 2
        if dual:
            raw_ref = refs[idx]; pre_ref = refs[idx + 1]; idx += 2
        else:
            out_ref = refs[idx]; idx += 1
        acc_ref = refs[idx] if multi_k else None

        def finish(acc):
            if has_residual:
                acc = acc + res_ref[...].astype(jnp.float32)
            if dual:
                raw_ref[...] = acc.astype(raw_ref.dtype)
                pre_ref[...] = jnp.maximum(
                    acc * s_ref[...] + t_ref[...], 0.0).astype(pre_ref.dtype)
            elif has_affine:
                out_ref[...] = jnp.maximum(
                    acc * s_ref[...] + t_ref[...], 0.0).astype(out_ref.dtype)
            else:
                out_ref[...] = acc.astype(out_ref.dtype)

        if multi_k:
            @pl.when(pl.program_id(2) == 0)
            def _():
                acc_ref[...] = jnp.zeros_like(acc_ref)

            acc_ref[...] += jnp.dot(a_ref[...], b_ref[...],
                                    preferred_element_type=jnp.float32)

            @pl.when(pl.program_id(2) == pl.num_programs(2) - 1)
            def _():
                finish(acc_ref[...])
        else:
            finish(jnp.dot(a_ref[...], b_ref[...],
                           preferred_element_type=jnp.float32))

    return kernel


def pallas_matmul(a, b, *, scale=None, shift=None, residual=None,
                  dual_scale=None, dual_shift=None, out_dtype=ACT_DTYPE):
    """(M,K) @ (K,N) with bf16 MXU inputs, f32 accumulation and fused
    epilogue.  Returns one array, or (raw, pre) when dual_scale is given."""
    M, K = a.shape
    K2, N = b.shape
    assert K == K2, (K, K2)
    dual = dual_scale is not None
    has_affine = dual or (scale is not None)
    has_residual = residual is not None

    tm = _pick_tile(M, 1024, 16)      # rows:   mult of 16 (bf16 sublane tile)
    tn = _pick_tile(N, 256, 128)      # cols:   mult of 128 (lane-dense)
    tk = _pick_tile(K, 4608, 128)     # reduce: full K at these shapes
    # Keep >= 2 blocks on a parallel axis so both v7x TensorCores get work.
    if M // tm == 1 and N // tn == 1:
        if N >= 256 and (N // 2) % 128 == 0:
            tn = N // 2
        elif M >= 32 and (M // 2) % 16 == 0:
            tm = M // 2
    nm, nn, nk = M // tm, N // tn, K // tk
    multi_k = nk > 1

    if multi_k:
        grid = (nm, nn, nk)
        a_map = lambda i, j, k: (i, k)
        b_map = lambda i, j, k: (k, j)
        o_map = lambda i, j, k: (i, j)
        c_map = lambda i, j, k: (0, j)
        dims = ("parallel", "parallel", "arbitrary")
        scratch = [pltpu.VMEM((tm, tn), jnp.float32)]
    else:
        grid = (nm, nn)
        a_map = lambda i, j: (i, 0)
        b_map = lambda i, j: (0, j)
        o_map = lambda i, j: (i, j)
        c_map = lambda i, j: (0, j)
        dims = ("parallel", "parallel")
        scratch = []

    in_specs = [pl.BlockSpec((tm, tk), a_map),
                pl.BlockSpec((tk, tn), b_map)]
    args = [a, b]
    if has_residual:
        in_specs.append(pl.BlockSpec((tm, tn), o_map))
        args.append(residual)
    if has_affine:
        sc = dual_scale if dual else scale
        sh = dual_shift if dual else shift
        in_specs += [pl.BlockSpec((1, tn), c_map),
                     pl.BlockSpec((1, tn), c_map)]
        args += [sc, sh]

    if dual:
        out_shape = (jax.ShapeDtypeStruct((M, N), out_dtype),
                     jax.ShapeDtypeStruct((M, N), out_dtype))
        out_specs = (pl.BlockSpec((tm, tn), o_map),
                     pl.BlockSpec((tm, tn), o_map))
    else:
        out_shape = jax.ShapeDtypeStruct((M, N), out_dtype)
        out_specs = pl.BlockSpec((tm, tn), o_map)

    return pl.pallas_call(
        _make_mm_kernel(multi_k, has_residual, has_affine, dual),
        out_shape=out_shape,
        grid=grid,
        in_specs=in_specs,
        out_specs=out_specs,
        scratch_shapes=scratch,
        compiler_params=pltpu.CompilerParams(dimension_semantics=dims),
    )(*args)


# ----------------------------- fused avgpool + linear -------------------------

def _pool_linear_kernel(x_ref, w_ref, b_ref, o_ref):
    pooled = jnp.mean(x_ref[...].astype(jnp.float32), axis=1)        # (N, C)
    o_ref[...] = (jnp.dot(pooled.astype(MXU_DTYPE), w_ref[...],
                          preferred_element_type=jnp.float32) + b_ref[...])


def pallas_pool_linear(x, w2d, b2d, num_classes):
    """x: (N, HW, C) bf16; w2d: (C, P) bf16; b2d: (1, P) f32 (P = classes
    padded to 128).  Fuses F.avg_pool2d(out, 4) + linear + bias; returns
    f32 logits sliced to num_classes."""
    N, HW, C = x.shape
    P = w2d.shape[1]
    out = pl.pallas_call(
        _pool_linear_kernel,
        out_shape=jax.ShapeDtypeStruct((N, P), jnp.float32),
        grid=(1,),
        in_specs=[pl.BlockSpec((N, HW, C), lambda i: (i, 0, 0)),
                  pl.BlockSpec((C, P), lambda i: (0, 0)),
                  pl.BlockSpec((1, P), lambda i: (0, 0))],
        out_specs=pl.BlockSpec((N, P), lambda i: (i, 0)),
        compiler_params=pltpu.CompilerParams(
            dimension_semantics=("parallel",)),
    )(x, w2d, b2d)
    return out[:, :num_classes]


# ----------------------------- conv = im2col + matmul -------------------------

def _im2col(x, k, stride, padding):
    """x: (N,H,W,C) -> (N*OH*OW, k*k*C); tap-major, channel-minor ordering."""
    N, H, W, C = x.shape
    if padding:
        x = jnp.pad(x, ((0, 0), (padding, padding), (padding, padding), (0, 0)))
    OH = (H + 2 * padding - k) // stride + 1
    OW = (W + 2 * padding - k) // stride + 1
    cols = []
    for i in range(k):
        for j in range(k):
            cols.append(x[:, i:i + stride * OH:stride, j:j + stride * OW:stride, :])
    patches = jnp.concatenate(cols, axis=-1)            # (N, OH, OW, k*k*C)
    return patches.reshape(N * OH * OW, k * k * C), (N, OH, OW)


def conv2d(x, w2d, ksize, stride, padding, *, scale=None, shift=None,
           residual=None, dual_scale=None, dual_shift=None):
    """Conv as im2col + MXU matmul with the elementwise tail fused into the
    matmul epilogue.  `w2d` is a prepared (k*k*Cin_phys[, K-padded], Cout_phys)
    bf16 weight."""
    patches, (n, oh, ow) = _im2col(x, ksize, stride, padding)
    K = patches.shape[1]
    K_w, cout = w2d.shape
    if K_w != K:                                   # stem: K 27 -> 128 (zeros)
        patches = jnp.pad(patches, ((0, 0), (0, K_w - K)))
    out = pallas_matmul(patches, w2d, scale=scale, shift=shift,
                        residual=residual,
                        dual_scale=dual_scale, dual_shift=dual_shift)
    if isinstance(out, tuple):
        return tuple(o.reshape(n, oh, ow, cout) for o in out)
    return out.reshape(n, oh, ow, cout)


# ----------------------------- parameter preparation --------------------------

def _cphys(c):
    """Physical (lane-dense) channel count: pad anything below 128 up to 128."""
    return max(c, LANE_PAD)


def _prep_conv_w(w_hwio, cin_phys, cout_phys, k_pad_to=None):
    k, _, cin, cout = w_hwio.shape
    w = jnp.pad(w_hwio, ((0, 0), (0, 0),
                         (0, cin_phys - cin), (0, cout_phys - cout)))
    w2d = w.reshape(k * k * cin_phys, cout_phys)
    if k_pad_to is not None and w2d.shape[0] < k_pad_to:
        w2d = jnp.pad(w2d, ((0, k_pad_to - w2d.shape[0]), (0, 0)))
    return w2d.astype(MXU_DTYPE)


def _prep_bn(bn, c_phys):
    scale = bn["gamma"] / jnp.sqrt(bn["var"] + BN_EPS)
    shift = bn["beta"] - bn["mean"] * scale
    c = scale.shape[0]
    if c_phys > c:
        scale = jnp.pad(scale, (0, c_phys - c), constant_values=1.0)
        shift = jnp.pad(shift, (0, c_phys - c))
    return (scale.reshape(1, c_phys).astype(jnp.float32),
            shift.reshape(1, c_phys).astype(jnp.float32))


def prepare_params(params):
    """Fold BN, reshape / pad / cast conv weights once, outside the forward."""
    blocks_raw = [blk for group in params["layers"] for blk in group]
    plan = {}

    # stem conv: K = 27 zero-padded to 128, Cout 64 zero-padded to 128;
    # the FIRST block's bn1 (+ReLU) is fused into the stem matmul epilogue.
    cout0 = params["conv_1"].shape[-1]
    cout0_phys = _cphys(cout0)
    plan["stem_w"] = _prep_conv_w(params["conv_1"], 3, cout0_phys, k_pad_to=128)
    plan["stem_next_scale"], plan["stem_next_shift"] = _prep_bn(
        blocks_raw[0]["bn1"], cout0_phys)

    blocks = []
    for i, blk in enumerate(blocks_raw):
        cin = blk["conv1_w"].shape[2]
        cout = blk["conv1_w"].shape[3]
        cin_phys, cout_phys = _cphys(cin), _cphys(cout)
        e = {
            "stride": blk["stride"],
            "conv1_w": _prep_conv_w(blk["conv1_w"], cin_phys, cout_phys),
            "conv2_w": _prep_conv_w(blk["conv2_w"], cout_phys, cout_phys),
            "shortcut_w": (_prep_conv_w(blk["shortcut_w"], cin_phys, cout_phys)
                           if "shortcut_w" in blk else None),
        }
        e["bn2_scale"], e["bn2_shift"] = _prep_bn(blk["bn2"], cout_phys)
        if i + 1 < len(blocks_raw):
            # next block's bn1 is fused into this block's conv2 epilogue
            ns, nt = _prep_bn(blocks_raw[i + 1]["bn1"], cout_phys)
        else:
            ns = nt = None
        e["next_scale"], e["next_shift"] = ns, nt
        blocks.append(e)
    plan["blocks"] = blocks

    ncls = params["linear_b"].shape[0]
    p = _cphys(ncls)
    plan["linear_w"] = jnp.pad(params["linear_w"],
                               ((0, 0), (0, p - ncls))).astype(MXU_DTYPE)
    plan["linear_b"] = jnp.pad(params["linear_b"],
                               (0, p - ncls)).reshape(1, p).astype(jnp.float32)
    plan["num_classes"] = ncls
    return plan


# ----------------------------- model -------------------------------------------

def preact_block_forward(x_raw, pre, blk):
    """Pre-activation residual block (EXPANSION = 1).

    `x_raw` is the raw (pre-bn1) input, `pre` = relu(bn1(x_raw)) was already
    produced by the previous kernel's fused epilogue.  Returns
    (raw_out, pre_next) where pre_next is the NEXT block's pre-activation
    (None for the last block)."""
    s = blk["stride"]
    if blk["shortcut_w"] is not None:
        shortcut = conv2d(pre, blk["shortcut_w"], 1, s, 0)
    else:
        shortcut = x_raw
    # conv1 with this block's bn2 + ReLU fused into the matmul epilogue
    out = conv2d(pre, blk["conv1_w"], 3, s, 1,
                 scale=blk["bn2_scale"], shift=blk["bn2_shift"])
    n, oh, ow, c = out.shape
    res2d = shortcut.reshape(n * oh * ow, c)
    if blk["next_scale"] is not None:
        # conv2 + residual add + next block's bn1+ReLU, dual output
        raw, pre_next = conv2d(out, blk["conv2_w"], 3, 1, 1,
                               residual=res2d,
                               dual_scale=blk["next_scale"],
                               dual_shift=blk["next_shift"])
        return raw, pre_next
    raw = conv2d(out, blk["conv2_w"], 3, 1, 1, residual=res2d)
    return raw, None


def preact_resnet_forward(plan, x_nchw):
    x = jnp.transpose(x_nchw, (0, 2, 3, 1)).astype(ACT_DTYPE)   # NCHW -> NHWC
    # stem conv with the first block's bn1+ReLU fused (dual output)
    raw, pre = conv2d(x, plan["stem_w"], 3, 1, 1,
                      dual_scale=plan["stem_next_scale"],
                      dual_shift=plan["stem_next_shift"])
    for blk in plan["blocks"]:
        raw, pre = preact_block_forward(raw, pre, blk)
    N, H, W, C = raw.shape
    assert H == 4 and W == 4, "input spatial size must be 32x32 (CIFAR-like)"
    # fused avg_pool2d(., 4) + linear + bias
    return pallas_pool_linear(raw.reshape(N, H * W, C),
                              plan["linear_w"], plan["linear_b"],
                              plan["num_classes"])


# ----------------------------- pure-JAX f32 reference --------------------------

def reference_forward(params, x_nchw):
    x = jnp.transpose(x_nchw, (0, 2, 3, 1)).astype(jnp.float32)

    def conv(v, w, s, p):
        return jax.lax.conv_general_dilated(
            v, w, (s, s), [(p, p), (p, p)],
            dimension_numbers=("NHWC", "HWIO", "NHWC"))

    def bn_fold(bn):
        scale = bn["gamma"] / jnp.sqrt(bn["var"] + BN_EPS)
        return scale, bn["beta"] - bn["mean"] * scale

    def bnr(v, bn):
        scale, shift = bn_fold(bn)
        return jnp.maximum(v * scale + shift, 0.0)

    out = conv(x, params["conv_1"], 1, 1)
    for group in params["layers"]:
        for p in group:
            pre = bnr(out, p["bn1"])
            sc = conv(pre, p["shortcut_w"], p["stride"], 0) if "shortcut_w" in p else out
            o = conv(pre, p["conv1_w"], p["stride"], 1)
            o = bnr(o, p["bn2"])
            o = conv(o, p["conv2_w"], 1, 1)
            out = o + sc
    pooled = jnp.mean(out, axis=(1, 2))
    return pooled @ params["linear_w"] + params["linear_b"]


# ----------------------------- parameter init ----------------------------------

def _conv_init(key, k, cin, cout):
    fan_in = k * k * cin
    return jax.random.normal(key, (k, k, cin, cout), jnp.float32) * (2.0 / fan_in) ** 0.5


def _bn_init(key, c):
    k1, k2, k3, k4 = jax.random.split(key, 4)
    return {"gamma": 1.0 + 0.1 * jax.random.normal(k1, (c,), jnp.float32),
            "beta": 0.1 * jax.random.normal(k2, (c,), jnp.float32),
            "mean": 0.1 * jax.random.normal(k3, (c,), jnp.float32),
            "var": 1.0 + 0.1 * jax.random.uniform(k4, (c,), jnp.float32)}


def init_params(key, num_blocks, num_classes=10):
    keys = iter(jax.random.split(key, 256))
    params = {}
    in_slices = 64
    params["conv_1"] = _conv_init(next(keys), 3, 3, 64)          # conv 3->64, 3x3
    layers = []
    for slices, nb, stride0 in zip((64, 128, 256, 512), num_blocks, (1, 2, 2, 2)):
        group = []
        strides = [stride0] + [1] * (nb - 1)
        for s in strides:
            blk = {"stride": s,
                   "bn1": _bn_init(next(keys), in_slices),
                   "conv1_w": _conv_init(next(keys), 3, in_slices, slices),
                   "bn2": _bn_init(next(keys), slices),
                   "conv2_w": _conv_init(next(keys), 3, slices, slices)}
            if s != 1 or in_slices != EXPANSION * slices:
                blk["shortcut_w"] = _conv_init(next(keys), 1, in_slices,
                                               EXPANSION * slices)
            group.append(blk)
            in_slices = slices * EXPANSION
        layers.append(group)
    params["layers"] = layers
    kw, kb = jax.random.split(next(keys))
    params["linear_w"] = jax.random.normal(
        kw, (512 * EXPANSION, num_classes), jnp.float32) * (1.0 / (512 * EXPANSION)) ** 0.5
    params["linear_b"] = 0.01 * jax.random.normal(kb, (num_classes,), jnp.float32)
    return params


# ----------------------------- main ---------------------------------------------

if __name__ == "__main__":
    key = jax.random.PRNGKey(0)
    kp, kx = jax.random.split(key)
    num_blocks = [1, 1, 1, 1]          # one pre-activation block per group (small)
    params = init_params(kp, num_blocks, num_classes=10)
    plan = prepare_params(params)
    # PyTorch-style NCHW input; spatial 32 so that avg_pool2d(., 4) sees 4x4 maps.
    x = jax.random.normal(kx, (2, 3, 32, 32), jnp.float32)

    logits = preact_resnet_forward(plan, x)
    jax.block_until_ready(logits)
    assert logits.shape == (2, 10)
    assert bool(jnp.all(jnp.isfinite(logits)))

    # Loose bf16-vs-f32 sanity check against a pure-JAX reference.
    ref = reference_forward(params, x)
    err = float(jnp.max(jnp.abs(logits.astype(jnp.float32) - ref)))
    tol = 0.25 * float(jnp.max(jnp.abs(ref))) + 0.25
    assert err <= tol, f"mismatch vs f32 reference: {err} > {tol}"

    print("KERNEL_OK")
</pallas_src>

<mosaic_0001>
module attributes {stable_mosaic.version = 11 : i64} {
  func.func @kernel(%arg0: i32, %arg1: i32, %arg2: memref<1024x128xbf16, #tpu.memory_space<vmem>>, %arg3: memref<128x128xbf16, #tpu.memory_space<vmem>>, %arg4: memref<1x128xf32, #tpu.memory_space<vmem>>, %arg5: memref<1x128xf32, #tpu.memory_space<vmem>>, %arg6: memref<1024x128xbf16, #tpu.memory_space<vmem>>, %arg7: memref<1024x128xbf16, #tpu.memory_space<vmem>>) attributes {dimension_semantics = [#tpu.dimension_semantics<parallel>, #tpu.dimension_semantics<parallel>], iteration_bounds = array<i64: 2, 1>, scalar_prefetch = 0 : i64, scratch_operands = 0 : i64, tpu.core_type = #tpu.core_type<tc>, window_params = [{transform_indices = @transform_0, window_bounds = array<i64: 1024, 128>}, {transform_indices = @transform_1, window_bounds = array<i64: 128, 128>}, {transform_indices = @transform_2, window_bounds = array<i64: 1, 128>}, {transform_indices = @transform_3, window_bounds = array<i64: 1, 128>}, {transform_indices = @transform_4, window_bounds = array<i64: 1024, 128>}, {transform_indices = @transform_5, window_bounds = array<i64: 1024, 128>}]} {
    %c0 = arith.constant 0 : index
    %c0_0 = arith.constant 0 : index
    %0 = vector.load %arg2[%c0, %c0_0] : memref<1024x128xbf16, #tpu.memory_space<vmem>>, vector<1024x128xbf16>
    %c0_1 = arith.constant 0 : index
    %c0_2 = arith.constant 0 : index
    %1 = vector.load %arg3[%c0_1, %c0_2] : memref<128x128xbf16, #tpu.memory_space<vmem>>, vector<128x128xbf16>
    %cst = arith.constant dense<0.000000e+00> : vector<1024x128xf32>
    %2 = tpu.matmul %0, %1, %cst {dimension_numbers = #tpu.dot_dimension_numbers<[1], [0], [0], [1], [0, 0, 1, 1], [], []>} : vector<1024x128xbf16>, vector<128x128xbf16>, vector<1024x128xf32> -> vector<1024x128xf32>
    %3 = arith.truncf %2 : vector<1024x128xf32> to vector<1024x128xbf16>
    %c0_3 = arith.constant 0 : index
    %c0_4 = arith.constant 0 : index
    %4 = vector.load %arg6[%c0_3, %c0_4] : memref<1024x128xbf16, #tpu.memory_space<vmem>>, vector<1024x128xbf16>
    tpu.vector_store %arg6[%c0_3, %c0_4], %3 {strides = array<i32>} : memref<1024x128xbf16, #tpu.memory_space<vmem>>, vector<1024x128xbf16>,
    %c0_5 = arith.constant 0 : index
    %c0_6 = arith.constant 0 : index
    %5 = vector.load %arg4[%c0_5, %c0_6] : memref<1x128xf32, #tpu.memory_space<vmem>>, vector<1x128xf32>
    %6 = vector.broadcast %5 : vector<1x128xf32> to vector<1024x128xf32>
    %7 = arith.mulf %2, %6 : vector<1024x128xf32>
    %c0_7 = arith.constant 0 : index
    %c0_8 = arith.constant 0 : index
    %8 = vector.load %arg5[%c0_7, %c0_8] : memref<1x128xf32, #tpu.memory_space<vmem>>, vector<1x128xf32>
    %9 = vector.broadcast %8 : vector<1x128xf32> to vector<1024x128xf32>
    %10 = arith.addf %7, %9 : vector<1024x128xf32>
    %cst_9 = arith.constant 0.000000e+00 : f32
    %11 = vector.broadcast %cst_9 : f32 to vector<1024x128xf32>
    %12 = arith.maximumf %10, %11 : vector<1024x128xf32>
    %13 = arith.truncf %12 : vector<1024x128xf32> to vector<1024x128xbf16>
    %c0_10 = arith.constant 0 : index
    %c0_11 = arith.constant 0 : index
    %14 = vector.load %arg7[%c0_10, %c0_11] : memref<1024x128xbf16, #tpu.memory_space<vmem>>, vector<1024x128xbf16>
    tpu.vector_store %arg7[%c0_10, %c0_11], %13 {strides = array<i32>} : memref<1024x128xbf16, #tpu.memory_space<vmem>>, vector<1024x128xbf16>,
    return
  }
  func.func @transform_0(%arg0: i32, %arg1: i32) -> (i32, i32) {
    %c0_i32 = arith.constant 0 : i32
    %c0_i32_0 = arith.constant 0 : i32
    return %arg0, %c0_i32 : i32, i32
  }
  func.func @transform_1(%arg0: i32, %arg1: i32) -> (i32, i32) {
    %c0_i32 = arith.constant 0 : i32
    %c0_i32_0 = arith.constant 0 : i32
    return %c0_i32, %arg1 : i32, i32
  }
  func.func @transform_2(%arg0: i32, %arg1: i32) -> (i32, i32) {
    %c0_i32 = arith.constant 0 : i32
    %c0_i32_0 = arith.constant 0 : i32
    return %c0_i32, %arg1 : i32, i32
  }
  func.func @transform_3(%arg0: i32, %arg1: i32) -> (i32, i32) {
    %c0_i32 = arith.constant 0 : i32
    %c0_i32_0 = arith.constant 0 : i32
    return %c0_i32, %arg1 : i32, i32
  }
  func.func @transform_4(%arg0: i32, %arg1: i32) -> (i32, i32) {
    %c0_i32 = arith.constant 0 : i32
    return %arg0, %arg1 : i32, i32
  }
  func.func @transform_5(%arg0: i32, %arg1: i32) -> (i32, i32) {
    %c0_i32 = arith.constant 0 : i32
    return %arg0, %arg1 : i32, i32
  }
}

</mosaic_0001>

<bundles_post_ra>
// kernel: tpu_custom_call.1
= control target key start
LH: loop header
LB: loop body
LE: loop exit
PB: predicated region body
PF: predicated region fallthrough
CT: control target
= control target key end

     0   :  { %s4471_s0 = inlined_call_operand.hbm [shape: bf16[2048,128], index: 0, kind: input, shape index: {}]   ;;  %s4472_s1 = inlined_call_operand.hbm [shape: bf16[128,128], index: 1, kind: input, shape index: {}]   ;;  %s4473_s2 = inlined_call_operand.vmem [shape: f32[1,128], index: 2, kind: input, shape index: {}]   ;;  %s4474_s3 = inlined_call_operand.vmem [shape: f32[1,128], index: 3, kind: input, shape index: {}]   ;;  %s4475_s4 = inlined_call_operand.hbm [shape: bf16[2048,128], index: 4, kind: output, shape index: {0}]   ;;  %s4476_s5 = inlined_call_operand.hbm [shape: bf16[2048,128], index: 5, kind: output, shape index: {1}]  }
   0x1   :  { %4482 = sst [smem:[#allocation16_spill]] %s4472_s1 }
   0x2   :  { %11 = vsyncpa [#allocation3], 0 }
   0x3   :  { %13 = vsyncpa [#allocation3 + $0x1], 0 }
   0x4   :  { %14 = vsyncpa [#allocation6], 0 }
   0x5   :  { %15 = vsyncpa [#allocation4], 0 }
   0x6   :  { %17 = vsyncpa [#allocation4 + $0x1], 0 }
   0x7   :  { %18 = vsyncpa [#allocation9], 0 }
   0x8   :  { %20 = vsyncpa [#allocation9 + $0x1], 0  ;;  %s3807_s18 = smov 0   ;;  %s3809_s19 = smov 0  }
   0x9   :  { %s3811_s20 = smov 0   ;;  %s3813_s21 = smov 0  }
   0xa   :  { %s3815_s22 = smov 0   ;;  %s3817_s23 = smov 0  }
   0xb LB: > { %4483 = sst [smem:[#allocation14_spill]] %s3770_s23  ;;  %s2330_s24 = sadd.s32 4294967295, %s3770_s23   ;;  %s3770_s23 = sphi %s3817_s23, %s26_s23   ;;  %s3766_s22 = sphi %s3815_s22, %s4501_s22   ;;  %s3762_s21 = sphi %s3813_s21, %s4500_s21   ;;  %s3758_s20 = sphi %s3811_s20, %s4499_s20   ;;  %s3754_s19 = sphi %s3809_s19, %s4498_s19   ;;  %s3750_s18 = sphi %s3807_s18, %s4497_s18  }
   0xc   : > { %s2331_s25 = sadd.s32 4294967294, %s3770_s23   ;;  %p58_p0 = scmp.ne.s32.totalorder %s3754_s19, %s3750_s18 }
   0xd   : > { %p3841_p1 = scmp.eq.s32.totalorder %s2330_s24, 0  ;;  %p3845_p2 = scmp.eq.s32.totalorder %s2330_s24, 1 }
   0xe   : > { %p168_p3 = scmp.eq.s32.totalorder %s2331_s25, 1  ;;  %p2332_p5 = scmp.ge.s32.totalorder %s3770_s23, 1 }
   0xf   : > { %p3851_p4 = por %p3841_p1, %p58_p0  ;;  %p203_p7 = scmp.lt.s32.totalorder %s3770_s23, 3 }
  0x10   : > { %p3856_p6 = por %p168_p3, %p58_p0  ;;  %s4488_s1 = sld [smem:[#allocation16_spill]] }
  0x11   : > { %p3864_p8 = pnand %p2332_p5, %p203_p7  ;;  %s3772_s9 = smov [#allocation5]  }
  0x12   : > { %s218_s10 = sshll.u32 %s3772_s9, 4  ;;  %p2336_p11 = scmp.ge.s32.totalorder %s3770_s23, 2  ;;  %s219_s10 = int_to_ptr.vmem [resolvable:$true] %s218_s10 }
  0x13   : > { %p3516_p9 = pneg %p3864_p8  ;;  %s4477_s11 = smov 64  }
  0x14   : > { %s4478_s12 = smov 4   ;;  %s38_s13 = sadd.s32 1, %s3766_s22 }
  0x15   : > { %p3517_p10 = pnand %p3516_p9, %p3841_p1  ;;  %p40_p12 = scmp.ge.s32.totalorder %s38_s13, 2 }
  0x16   : > { %s216_s7 = sshll.u32 %s4488_s1, 4  ;;  %s45_s14 = sadd.s32 1, %s3758_s20  ;;  %s217_s7 = int_to_ptr.hbm [resolvable:$true] %s216_s7 }
  0x17   : > { %3519 = dma.hbm_to_vmem [thread:$0]  (!%p3517_p10), %s217_s7, 1024, %s219_s10, [#allocation6], %s4477_s11, %s4477_s11, %s4478_s12  }
  0x18   : > { %p52_p13 = scmp.ne.s32.totalorder %s3758_s20, %s3754_s19  ;;  %p53_p0 = scmp.eq.s32.totalorder %s3770_s23, 0 }
  0x19   : > { %s4503_s13 = smov (%p40_p12, %s38_s13), 0  ;;  %p3532_p7 = scmp.lt.s32.totalorder %s3770_s23, 2 }
  0x1a   : > { %4490 = sst [smem:[#allocation15_spill]] %s4503_s13  ;;  %p3883_p3 = por %p53_p0, %p52_p13 }
  0x1b   : > { %p3889_p5 = por %p3845_p2, %p52_p13  ;;  %s42_s17 = ssub.s32 %s3766_s22, %s4503_s13 }
  0x1c   : > { %p43_p9 = scmp.eq.s32.totalorder %s42_s17, 0  ;;  %s244_s24 = sand.u32 1, %s3758_s20  }
  0x1d   : > { %s2337_s25 = sshll.u32 %s244_s24, 9  ;;  %s2641_s6 = sshll.u32 %s3766_s22, 9 }
  0x1e   : > { %s3898_s30 = scalar_select %p43_p9, %s3758_s20, %s45_s14  }
  0x1f   : > { %s253_s10 = scalar_lea.hbm %s4471_s0, %s2641_s6  ;;  %s248_s11 = scalar_lea.vmem [#allocation2], %s2337_s25 }
  0x20   : > { %s256_s12 = sshll.u32 %s248_s11, 4  ;;  %s254_s27 = sshll.u32 %s253_s10, 4  ;;  %s257_s12 = int_to_ptr.vmem [resolvable:$true] %s256_s12  ;;  %s255_s27 = int_to_ptr.hbm [resolvable:$true] %s254_s27 }
  0x21   : > { %p3521_p2 = pnand %p3532_p7, %p3883_p3  ;;  %s245_s1 = scalar_lea.sflag [#allocation3], %s244_s24 }
  0x22   : > { %s4493_s13 = smov 4   ;;  %s4494_s23 = smov 64  }
  0x23   : > { %3523 = dma.hbm_to_vmem [thread:$0]  (!%p3521_p2), %s255_s27, 8192, %s257_s12, %s245_s1, %s4494_s23, %s4494_s23, %s4493_s13  }
  0x24   : > { %268 = sbr.rel (%p3864_p8) target bundleno = 477 (0x1dd), region = 36  ;;  %s3912_s14 = sand.u32 (!%p3864_p8), 1, %s3754_s19  }
  0x25   : > { %s3915_s11 = sshll.u32 (!%p3864_p8), %s3912_s14, 9  ;;  %s271_s17 = scalar_lea.sflag (!%p3864_p8), [#allocation3], %s3912_s14 }
  0x26   : > { %s3919_s15 = scalar_lea.vmem (!%p3864_p8), [#allocation2], %s3915_s11 }
  0x29   : > { %3733 = dma.done.wait (%p3851_p4), %s271_s17, 8192  }
  0x2a   : > { %3735 = vsyncadd (%p3851_p4), %s271_s17, 4294959104 }
  0x2b   : > { %3737 = dma.done.wait (%p3841_p1), [#allocation6], 1024  }
  0x2c   : > { %3739 = vsyncadd (%p3841_p1), [#allocation6], 4294966272  ;;  %v2713_v0 = vld [vmem:[#allocation5 + $0x38] sm:$0xff]  ;;  %v2712_v1 = vld [vmem:[#allocation5 + $0x30] sm:$0xff]  ;;  %s3984_s8 = scalar_lea.vmem [#allocation7], %s3915_s11  ;;  %s3999_s12 = scalar_lea.vmem [#allocation8], %s3915_s11 }
  0x2d   : > { %903 = vmatpush.bf16.msra.mxu0 %v2713_v0  ;;  %3482 = vmatpush.bf16.msra.mxu1 %v2713_v0  ;;  %v2711_v2 = vld [vmem:[#allocation5 + $0x28] sm:$0xff]  ;;  %v2710_v3 = vld [vmem:[#allocation5 + $0x20] sm:$0xff]  ;;  %v2709_v4 = vld [vmem:[#allocation5 + $0x18] sm:$0xff]  ;;  %s2714_s7 = sshll.u32 %s3762_s21, 9  ;;  %s2155_s11 = sshll.u32 %s3984_s8, 4  ;;  %s4410_s11 = int_to_ptr.vmem [resolvable:$true] %s2155_s11 }
  0x2e   : > { %3483 = vmatpush.bf16.msra.mxu2 %v2713_v0  ;;  %3484 = vmatpush.bf16.msra.mxu3 %v2713_v0  ;;  %v2708_v5 = vld [vmem:[#allocation5 + $0x10] sm:$0xff]  ;;  %v2707_v6 = vld [vmem:[#allocation5 + $0x8] sm:$0xff]  ;;  %v2706_v7 = vld [vmem:[#allocation5] sm:$0xff]  ;;  %s2154_s27 = scalar_lea.hbm %s4475_s4, %s2714_s7  ;;  %s4407_s23 = scalar_lea.hbm %s4476_s5, %s2714_s7 }
  0x2f   : > { %v2642_v8 = vld [vmem:[%s3919_s15] sm:$0xff]  ;;  %v2643_v12 = vld [vmem:[%s3919_s15 + $0x8] sm:$0xff]  ;;  %v2644_v16 = vld [vmem:[%s3919_s15 + $0x10] sm:$0xff]  ;;  %s2157_s17 = sshll.u32 %s2154_s27, 4  ;;  %s2173_s21 = sshll.u32 %s3999_s12, 4  ;;  %s4412_s17 = int_to_ptr.hbm [resolvable:$true] %s2157_s17  ;;  %s2174_s21 = int_to_ptr.vmem [resolvable:$true] %s2173_s21 }
  0x30   : > { %v2658_v9 = vld [vmem:[%s3919_s15 + $0x80] sm:$0xff]  ;;  %v2659_v13 = vld [vmem:[%s3919_s15 + $0x88] sm:$0xff]  ;;  %v2660_v17 = vld [vmem:[%s3919_s15 + $0x90] sm:$0xff]  ;;  %s2175_s26 = sshll.u32 %s4407_s23, 4  ;;  %s2137_s28 = scalar_lea.sflag [#allocation4], %s3912_s14  ;;  %s2176_s26 = int_to_ptr.hbm [resolvable:$true] %s2175_s26 }
  0x31   : > { %904 = vmatpush.bf16.msra.mxu0 %v2712_v1  ;;  %3485 = vmatpush.bf16.msra.mxu1 %v2712_v1  ;;  %v2674_v10 = vld [vmem:[%s3919_s15 + $0x100] sm:$0xff]  ;;  %v2675_v14 = vld [vmem:[%s3919_s15 + $0x108] sm:$0xff]  ;;  %v2676_v18 = vld [vmem:[%s3919_s15 + $0x110] sm:$0xff]  ;;  %s3666_s13 = sshra.s32 %s4412_s17, 4  ;;  %s3672_s7 = scalar_lea.hbm %s4475_s4, 1024  ;;  %s3667_s13 = int_to_ptr.hbm [resolvable:$true] %s3666_s13 }
  0x32   : > { %3486 = vmatpush.bf16.msra.mxu2 %v2712_v1  ;;  %3487 = vmatpush.bf16.msra.mxu3 %v2712_v1  ;;  %v2690_v11 = vld [vmem:[%s3919_s15 + $0x180] sm:$0xff]  ;;  %v2691_v15 = vld [vmem:[%s3919_s15 + $0x188] sm:$0xff]  ;;  %v2692_v19 = vld [vmem:[%s3919_s15 + $0x190] sm:$0xff]  ;;  %s3668_s24 = scalar_lea.hbm %s3667_s13, 512  ;;  %p3673_p10 = scmp.lt.s32.totalorder %s3667_s13, %s4475_s4 }
  0x33   : > { %v2645_v20 = vld [vmem:[%s3919_s15 + $0x18] sm:$0xff]  ;;  %v2646_v24 = vld [vmem:[%s3919_s15 + $0x20] sm:$0xff]  ;;  %v2647_v28 = vld [vmem:[%s3919_s15 + $0x28] sm:$0xff]  ;;  %p3669_p1 = scmp.ne.s32.totalorder %s3667_s13, %s3668_s24  ;;  %p3674_p12 = scmp.lt.s32.totalorder %s3672_s7, %s3668_s24 }
  0x34   : > { %v2661_v21 = vld [vmem:[%s3919_s15 + $0x98] sm:$0xff]  ;;  %v2662_v25 = vld [vmem:[%s3919_s15 + $0xa0] sm:$0xff]  ;;  %v2663_v29 = vld [vmem:[%s3919_s15 + $0xa8] sm:$0xff] }
  0x35   : > { %905 = vmatpush.bf16.msra.mxu0 %v2711_v2  ;;  %3488 = vmatpush.bf16.msra.mxu1 %v2711_v2  ;;  %v2677_v22 = vld [vmem:[%s3919_s15 + $0x118] sm:$0xff]  ;;  %v2678_v26 = vld [vmem:[%s3919_s15 + $0x120] sm:$0xff]  ;;  %v2679_v30 = vld [vmem:[%s3919_s15 + $0x128] sm:$0xff]  ;;  %p3670_p4 = pnand %p3669_p1, %p3889_p5  ;;  %p3675_p13 = por %p3674_p12, %p3673_p10 }
  0x36   : > { %3489 = vmatpush.bf16.msra.mxu2 %v2711_v2  ;;  %3490 = vmatpush.bf16.msra.mxu3 %v2711_v2  ;;  %v2693_v23 = vld [vmem:[%s3919_s15 + $0x198] sm:$0xff]  ;;  %v2694_v27 = vld [vmem:[%s3919_s15 + $0x1a0] sm:$0xff]  ;;  %v2695_v31 = vld [vmem:[%s3919_s15 + $0x1a8] sm:$0xff] }
  0x37   : > { %v2648_v32 = vld [vmem:[%s3919_s15 + $0x30] sm:$0xff]  ;;  %v2649_v36 = vld [vmem:[%s3919_s15 + $0x38] sm:$0xff]  ;;  %v2650_v40 = vld [vmem:[%s3919_s15 + $0x40] sm:$0xff]  ;;  %p3671_p8 = pneg %p3670_p4 }
  0x38   : > { %v2664_v33 = vld [vmem:[%s3919_s15 + $0xb0] sm:$0xff]  ;;  %v2665_v37 = vld [vmem:[%s3919_s15 + $0xb8] sm:$0xff]  ;;  %v2666_v41 = vld [vmem:[%s3919_s15 + $0xc0] sm:$0xff] }
  0x39   : > { %906 = vmatpush.bf16.msra.mxu0 %v2710_v3  ;;  %3491 = vmatpush.bf16.msra.mxu1 %v2710_v3  ;;  %v2680_v34 = vld [vmem:[%s3919_s15 + $0x130] sm:$0xff]  ;;  %v2681_v38 = vld [vmem:[%s3919_s15 + $0x138] sm:$0xff]  ;;  %v3966_v43 = vld [vmem:[%s4473_s2] ss:$0 sm:$0xff]  ;;  %p3676_p0 = pnand %p3675_p13, %p3671_p8 }
  0x3a   : > { %3492 = vmatpush.bf16.msra.mxu2 %v2710_v3  ;;  %3493 = vmatpush.bf16.msra.mxu3 %v2710_v3  ;;  %v2696_v35 = vld [vmem:[%s3919_s15 + $0x1b0] sm:$0xff]  ;;  %v2697_v39 = vld [vmem:[%s3919_s15 + $0x1b8] sm:$0xff]  ;;  %v2682_v45 = vld [vmem:[%s3919_s15 + $0x140] sm:$0xff] }
  0x3b   : > { %v2698_v46 = vld [vmem:[%s3919_s15 + $0x1c0] sm:$0xff] }
  0x3c   : > { %v3974_v48 = vld [vmem:[%s4474_s3] ss:$0 sm:$0xff] }
  0x3d   : > { %907 = vmatpush.bf16.msra.mxu0 %v2709_v4  ;;  %3494 = vmatpush.bf16.msra.mxu1 %v2709_v4 }
  0x3e   : > { %3495 = vmatpush.bf16.msra.mxu2 %v2709_v4  ;;  %3496 = vmatpush.bf16.msra.mxu3 %v2709_v4 }
  0x41   : > { %908 = vmatpush.bf16.msra.mxu0 %v2708_v5  ;;  %3497 = vmatpush.bf16.msra.mxu1 %v2708_v5 }
  0x42   : > { %3498 = vmatpush.bf16.msra.mxu2 %v2708_v5  ;;  %3499 = vmatpush.bf16.msra.mxu3 %v2708_v5 }
  0x45   : > { %909 = vmatpush.bf16.msra.mxu0 %v2707_v6  ;;  %3500 = vmatpush.bf16.msra.mxu1 %v2707_v6 }
  0x46   : > { %3501 = vmatpush.bf16.msra.mxu2 %v2707_v6  ;;  %3502 = vmatpush.bf16.msra.mxu3 %v2707_v6 }
  0x49   : > { %910 = vmatpush.bf16.msra.mxu0 %v2706_v7  ;;  %3503 = vmatpush.bf16.msra.mxu1 %v2706_v7 }
  0x4a   : > { %3504 = vmatpush.bf16.msra.mxu2 %v2706_v7  ;;  %3505 = vmatpush.bf16.msra.mxu3 %v2706_v7 }
  0x4c   : > { %911 = vmatmul.bf16.vlgmr.msra.gmra.mxu0 %v2642_v8  ;;  %991 = vmatmul.bf16.vlgmr.msra.gmra.mxu1 %v2658_v9 }
  0x4d   : > { %1071 = vmatmul.bf16.vlgmr.msra.gmra.mxu2 %v2674_v10  ;;  %1151 = vmatmul.bf16.vlgmr.msra.gmra.mxu3 %v2690_v11  ;;  %v2651_v10 = vld [vmem:[%s3919_s15 + $0x48] sm:$0xff] }
  0x4e   : > { %v2667_v11 = vld [vmem:[%s3919_s15 + $0xc8] sm:$0xff] }
  0x5c   : > { %916 = vmatmul.bf16.gmra.mxu0 %v2643_v12  ;;  %996 = vmatmul.bf16.gmra.mxu1 %v2659_v13 }
  0x5d   : > { %1076 = vmatmul.bf16.gmra.mxu2 %v2675_v14  ;;  %1156 = vmatmul.bf16.gmra.mxu3 %v2691_v15 }
  0x6c   : > { %921 = vmatmul.bf16.gmra.mxu0 %v2644_v16  ;;  %1001 = vmatmul.bf16.gmra.mxu1 %v2660_v17 }
  0x6d   : > { %1081 = vmatmul.bf16.gmra.mxu2 %v2676_v18  ;;  %1161 = vmatmul.bf16.gmra.mxu3 %v2692_v19  ;;  %v2683_v18 = vld [vmem:[%s3919_s15 + $0x148] sm:$0xff] }
  0x6e   : > { %v2699_v19 = vld [vmem:[%s3919_s15 + $0x1c8] sm:$0xff] }
  0x7c   : > { %926 = vmatmul.bf16.gmra.mxu0 %v2645_v20  ;;  %1006 = vmatmul.bf16.gmra.mxu1 %v2661_v21 }
  0x7d   : > { %1086 = vmatmul.bf16.gmra.mxu2 %v2677_v22  ;;  %1166 = vmatmul.bf16.gmra.mxu3 %v2693_v23 }
  0x8c   : > { %931 = vmatmul.bf16.gmra.mxu0 %v2646_v24  ;;  %1011 = vmatmul.bf16.gmra.mxu1 %v2662_v25 }
  0x8d   : > { %1091 = vmatmul.bf16.gmra.mxu2 %v2678_v26  ;;  %1171 = vmatmul.bf16.gmra.mxu3 %v2694_v27 }
  0x9c   : > { %936 = vmatmul.bf16.gmra.mxu0 %v2647_v28  ;;  %1016 = vmatmul.bf16.gmra.mxu1 %v2663_v29 }
  0x9d   : > { %1096 = vmatmul.bf16.gmra.mxu2 %v2679_v30  ;;  %1176 = vmatmul.bf16.gmra.mxu3 %v2695_v31 }
  0xac   : > { %941 = vmatmul.bf16.gmra.mxu0 %v2648_v32  ;;  %1021 = vmatmul.bf16.gmra.mxu1 %v2664_v33 }
  0xad   : > { %1101 = vmatmul.bf16.gmra.mxu2 %v2680_v34  ;;  %1181 = vmatmul.bf16.gmra.mxu3 %v2696_v35 }
  0xbc   : > { %946 = vmatmul.bf16.gmra.mxu0 %v2649_v36  ;;  %1026 = vmatmul.bf16.gmra.mxu1 %v2665_v37 }
  0xbd   : > { %1106 = vmatmul.bf16.gmra.mxu2 %v2681_v38  ;;  %1186 = vmatmul.bf16.gmra.mxu3 %v2697_v39 }
  0xc9   : > { %v912_v42 = vpop.f32.mrf.mxu0  ;;  %v992_v44 = vpop.f32.mrf.mxu1 }
  0xca   : > { %v1492_v47 = vmul.f32 %v3966_v43, %v912_v42  ;;  %v1524_v49 = vmul.f32 %v3966_v43, %v992_v44 }
  0xcc   : > { %951 = vmatmul.bf16.gmra.mxu0 %v2650_v40  ;;  %1031 = vmatmul.bf16.gmra.mxu1 %v2666_v41  ;;  %v1624_v52 = vadd.f32 %v3974_v48, %v1492_v47  ;;  %v1656_v53 = vadd.f32 %v3974_v48, %v1524_v49 }
  0xcd   : > { %1111 = vmatmul.bf16.gmra.mxu2 %v2682_v45  ;;  %1191 = vmatmul.bf16.gmra.mxu3 %v2698_v46 }
  0xce   : > { %v1752_v0 = vmax.f32 %v1624_v52, 0.0  ;;  %v1784_v1 = vmax.f32 %v1656_v53, 0.0 }
  0xd0   : > { %v1072_v50 = vpop.f32.mrf.mxu2  ;;  %v1152_v51 = vpop.f32.mrf.mxu3 }
  0xd1   : > { %v914_v54 = vpop.f32.mrf.mxu0  ;;  %v994_v55 = vpop.f32.mrf.mxu1  ;;  %v1556_v60 = vmul.f32 %v3966_v43, %v1072_v50  ;;  %v1588_v61 = vmul.f32 %v3966_v43, %v1152_v51 }
  0xd2   : > { %v2719_v56 = vpack.c.bf16 %v914_v54, %v912_v42  ;;  %v1493_v57 = vmul.f32 %v3966_v43, %v914_v54  ;;  %v2799_v58 = vpack.c.bf16 %v994_v55, %v992_v44  ;;  %v1525_v59 = vmul.f32 %v3966_v43, %v994_v55 }
  0xd3   : > { %v1688_v4 = vadd.f32 %v3974_v48, %v1556_v60  ;;  %v1720_v5 = vadd.f32 %v3974_v48, %v1588_v61 }
  0xd4   : > { %2720 = vst [vmem:[%s3984_s8] sm:$0xff] %v2719_v56   ;;  %v1625_v62 = vadd.f32 %v3974_v48, %v1493_v57  ;;  %v1657_v63 = vadd.f32 %v3974_v48, %v1525_v59  ;;  %v2652_v56 = vld [vmem:[%s3919_s15 + $0x50] sm:$0xff] }
  0xd5   : > { %3371 = vst [vmem:[%s3984_s8 + $0x80] sm:$0xff] %v2799_v58   ;;  %v1816_v22 = vmax.f32 %v1688_v4, 0.0  ;;  %v1848_v23 = vmax.f32 %v1720_v5, 0.0  ;;  %v2668_v57 = vld [vmem:[%s3919_s15 + $0xd0] sm:$0xff] }
  0xd6   : > { %v1753_v2 = vmax.f32 %v1625_v62, 0.0  ;;  %v1785_v3 = vmax.f32 %v1657_v63, 0.0 }
  0xd8   : > { %v3039_v6 = vpack.c.bf16 %v1753_v2, %v1752_v0  ;;  %v3119_v7 = vpack.c.bf16 %v1785_v3, %v1784_v1  ;;  %v1074_v8 = vpop.f32.mrf.mxu2  ;;  %v1154_v9 = vpop.f32.mrf.mxu3  ;;  %v2684_v0 = vld [vmem:[%s3919_s15 + $0x150] sm:$0xff] }
  0xd9   : > { %v2879_v12 = vpack.c.bf16 %v1074_v8, %v1072_v50  ;;  %v1557_v13 = vmul.f32 %v3966_v43, %v1074_v8  ;;  %v2959_v14 = vpack.c.bf16 %v1154_v9, %v1152_v51  ;;  %v1589_v15 = vmul.f32 %v3966_v43, %v1154_v9  ;;  %v917_v16 = vpop.f32.mrf.mxu0  ;;  %v997_v17 = vpop.f32.mrf.mxu1  ;;  %v2700_v1 = vld [vmem:[%s3919_s15 + $0x1d0] sm:$0xff] }
  0xda   : > { %3040 = vst [vmem:[%s3999_s12] sm:$0xff] %v3039_v6   ;;  %v1494_v26 = vmul.f32 %v3966_v43, %v917_v16  ;;  %v1526_v27 = vmul.f32 %v3966_v43, %v997_v17 }
  0xdb   : > { %3434 = vst [vmem:[%s3999_s12 + $0x80] sm:$0xff] %v3119_v7   ;;  %v1689_v20 = vadd.f32 %v3974_v48, %v1557_v13  ;;  %v1721_v21 = vadd.f32 %v3974_v48, %v1589_v15 }
  0xdc   : > { %3387 = vst [vmem:[%s3984_s8 + $0x100] sm:$0xff] %v2879_v12   ;;  %956 = vmatmul.bf16.gmra.mxu0 %v2651_v10  ;;  %1036 = vmatmul.bf16.gmra.mxu1 %v2667_v11  ;;  %v1626_v32 = vadd.f32 %v3974_v48, %v1494_v26  ;;  %v1658_v33 = vadd.f32 %v3974_v48, %v1526_v27 }
  0xdd   : > { %v1817_v24 = vmax.f32 %v1689_v20, 0.0  ;;  %3403 = vst [vmem:[%s3984_s8 + $0x180] sm:$0xff] %v2959_v14   ;;  %v1849_v25 = vmax.f32 %v1721_v21, 0.0  ;;  %1116 = vmatmul.bf16.gmra.mxu2 %v2683_v18  ;;  %1196 = vmatmul.bf16.gmra.mxu3 %v2699_v19 }
  0xde   : > { %v1754_v45 = vmax.f32 %v1626_v32, 0.0  ;;  %v1786_v46 = vmax.f32 %v1658_v33, 0.0 }
  0xdf   : > { %v3199_v28 = vpack.c.bf16 %v1817_v24, %v1816_v22  ;;  %v3279_v29 = vpack.c.bf16 %v1849_v25, %v1848_v23 }
  0xe0   : > { %v1077_v30 = vpop.f32.mrf.mxu2  ;;  %v1157_v31 = vpop.f32.mrf.mxu3 }
  0xe1   : > { %3450 = vst [vmem:[%s3999_s12 + $0x100] sm:$0xff] %v3199_v28   ;;  %v919_v34 = vpop.f32.mrf.mxu0  ;;  %v999_v35 = vpop.f32.mrf.mxu1  ;;  %v1558_v40 = vmul.f32 %v3966_v43, %v1077_v30  ;;  %v1590_v41 = vmul.f32 %v3966_v43, %v1157_v31 }
  0xe2   : > { %3466 = vst [vmem:[%s3999_s12 + $0x180] sm:$0xff] %v3279_v29   ;;  %v2724_v36 = vpack.c.bf16 %v919_v34, %v917_v16  ;;  %v1495_v37 = vmul.f32 %v3966_v43, %v919_v34  ;;  %v2804_v38 = vpack.c.bf16 %v999_v35, %v997_v17  ;;  %v1527_v39 = vmul.f32 %v3966_v43, %v999_v35 }
  0xe3   : > { %v1690_v50 = vadd.f32 %v3974_v48, %v1558_v40  ;;  %v1722_v51 = vadd.f32 %v3974_v48, %v1590_v41 }
  0xe4   : > { %3356 = vst [vmem:[%s3984_s8 + $0x8] sm:$0xff] %v2724_v36   ;;  %v1627_v42 = vadd.f32 %v3974_v48, %v1495_v37  ;;  %v1659_v44 = vadd.f32 %v3974_v48, %v1527_v39  ;;  %v2653_v36 = vld [vmem:[%s3919_s15 + $0x58] sm:$0xff] }
  0xe5   : > { %3372 = vst [vmem:[%s3984_s8 + $0x88] sm:$0xff] %v2804_v38   ;;  %v1818_v4 = vmax.f32 %v1690_v50, 0.0  ;;  %v1850_v5 = vmax.f32 %v1722_v51, 0.0  ;;  %v2669_v37 = vld [vmem:[%s3919_s15 + $0xd8] sm:$0xff] }
  0xe6   : > { %v1755_v47 = vmax.f32 %v1627_v42, 0.0  ;;  %v1787_v49 = vmax.f32 %v1659_v44, 0.0 }
  0xe8   : > { %v3044_v52 = vpack.c.bf16 %v1755_v47, %v1754_v45  ;;  %v3124_v53 = vpack.c.bf16 %v1787_v49, %v1786_v46  ;;  %v1079_v54 = vpop.f32.mrf.mxu2  ;;  %v1159_v55 = vpop.f32.mrf.mxu3  ;;  %v2685_v45 = vld [vmem:[%s3919_s15 + $0x158] sm:$0xff] }
  0xe9   : > { %v2884_v58 = vpack.c.bf16 %v1079_v54, %v1077_v30  ;;  %v1559_v59 = vmul.f32 %v3966_v43, %v1079_v54  ;;  %v2964_v60 = vpack.c.bf16 %v1159_v55, %v1157_v31  ;;  %v1591_v61 = vmul.f32 %v3966_v43, %v1159_v55  ;;  %v922_v62 = vpop.f32.mrf.mxu0  ;;  %v1002_v63 = vpop.f32.mrf.mxu1  ;;  %v2701_v46 = vld [vmem:[%s3919_s15 + $0x1d8] sm:$0xff] }
  0xea   : > { %3419 = vst [vmem:[%s3999_s12 + $0x8] sm:$0xff] %v3044_v52   ;;  %v1496_v8 = vmul.f32 %v3966_v43, %v922_v62  ;;  %v1528_v9 = vmul.f32 %v3966_v43, %v1002_v63 }
  0xeb   : > { %3435 = vst [vmem:[%s3999_s12 + $0x88] sm:$0xff] %v3124_v53   ;;  %v1691_v2 = vadd.f32 %v3974_v48, %v1559_v59  ;;  %v1723_v3 = vadd.f32 %v3974_v48, %v1591_v61 }
  0xec   : > { %3388 = vst [vmem:[%s3984_s8 + $0x108] sm:$0xff] %v2884_v58   ;;  %961 = vmatmul.bf16.gmra.mxu0 %v2652_v56  ;;  %1041 = vmatmul.bf16.gmra.mxu1 %v2668_v57  ;;  %v1628_v14 = vadd.f32 %v3974_v48, %v1496_v8  ;;  %v1660_v15 = vadd.f32 %v3974_v48, %v1528_v9 }
  0xed   : > { %v1819_v6 = vmax.f32 %v1691_v2, 0.0  ;;  %3404 = vst [vmem:[%s3984_s8 + $0x188] sm:$0xff] %v2964_v60   ;;  %v1851_v7 = vmax.f32 %v1723_v3, 0.0  ;;  %1121 = vmatmul.bf16.gmra.mxu2 %v2684_v0  ;;  %1201 = vmatmul.bf16.gmra.mxu3 %v2700_v1 }
  0xee   : > { %v1756_v26 = vmax.f32 %v1628_v14, 0.0  ;;  %v1788_v27 = vmax.f32 %v1660_v15, 0.0 }
  0xef   : > { %v3204_v10 = vpack.c.bf16 %v1819_v6, %v1818_v4  ;;  %v3284_v11 = vpack.c.bf16 %v1851_v7, %v1850_v5 }
  0xf0   : > { %v1082_v12 = vpop.f32.mrf.mxu2  ;;  %v1162_v13 = vpop.f32.mrf.mxu3 }
  0xf1   : > { %3451 = vst [vmem:[%s3999_s12 + $0x108] sm:$0xff] %v3204_v10   ;;  %v924_v16 = vpop.f32.mrf.mxu0  ;;  %v1004_v17 = vpop.f32.mrf.mxu1  ;;  %v1560_v22 = vmul.f32 %v3966_v43, %v1082_v12  ;;  %v1592_v23 = vmul.f32 %v3966_v43, %v1162_v13 }
  0xf2   : > { %3467 = vst [vmem:[%s3999_s12 + $0x188] sm:$0xff] %v3284_v11   ;;  %v2729_v18 = vpack.c.bf16 %v924_v16, %v922_v62  ;;  %v1497_v19 = vmul.f32 %v3966_v43, %v924_v16  ;;  %v2809_v20 = vpack.c.bf16 %v1004_v17, %v1002_v63  ;;  %v1529_v21 = vmul.f32 %v3966_v43, %v1004_v17 }
  0xf3   : > { %v1692_v30 = vadd.f32 %v3974_v48, %v1560_v22  ;;  %v1724_v31 = vadd.f32 %v3974_v48, %v1592_v23 }
  0xf4   : > { %3357 = vst [vmem:[%s3984_s8 + $0x10] sm:$0xff] %v2729_v18   ;;  %v1629_v24 = vadd.f32 %v3974_v48, %v1497_v19  ;;  %v1661_v25 = vadd.f32 %v3974_v48, %v1529_v21  ;;  %v2654_v18 = vld [vmem:[%s3919_s15 + $0x60] sm:$0xff] }
  0xf5   : > { %3373 = vst [vmem:[%s3984_s8 + $0x90] sm:$0xff] %v2809_v20   ;;  %v1820_v50 = vmax.f32 %v1692_v30, 0.0  ;;  %v1852_v51 = vmax.f32 %v1724_v31, 0.0  ;;  %v2670_v19 = vld [vmem:[%s3919_s15 + $0xe0] sm:$0xff] }
  0xf6   : > { %v1757_v28 = vmax.f32 %v1629_v24, 0.0  ;;  %v1789_v29 = vmax.f32 %v1661_v25, 0.0 }
  0xf8   : > { %v3049_v32 = vpack.c.bf16 %v1757_v28, %v1756_v26  ;;  %v3129_v33 = vpack.c.bf16 %v1789_v29, %v1788_v27  ;;  %v1084_v34 = vpop.f32.mrf.mxu2  ;;  %v1164_v35 = vpop.f32.mrf.mxu3  ;;  %v2686_v26 = vld [vmem:[%s3919_s15 + $0x160] sm:$0xff] }
  0xf9   : > { %v2889_v38 = vpack.c.bf16 %v1084_v34, %v1082_v12  ;;  %v1561_v39 = vmul.f32 %v3966_v43, %v1084_v34  ;;  %v2969_v40 = vpack.c.bf16 %v1164_v35, %v1162_v13  ;;  %v1593_v41 = vmul.f32 %v3966_v43, %v1164_v35  ;;  %v927_v42 = vpop.f32.mrf.mxu0  ;;  %v1007_v44 = vpop.f32.mrf.mxu1  ;;  %v2702_v27 = vld [vmem:[%s3919_s15 + $0x1e0] sm:$0xff] }
  0xfa   : > { %3420 = vst [vmem:[%s3999_s12 + $0x10] sm:$0xff] %v3049_v32   ;;  %v1498_v54 = vmul.f32 %v3966_v43, %v927_v42  ;;  %v1530_v55 = vmul.f32 %v3966_v43, %v1007_v44 }
  0xfb   : > { %3436 = vst [vmem:[%s3999_s12 + $0x90] sm:$0xff] %v3129_v33   ;;  %v1693_v47 = vadd.f32 %v3974_v48, %v1561_v39  ;;  %v1725_v49 = vadd.f32 %v3974_v48, %v1593_v41 }
  0xfc   : > { %3389 = vst [vmem:[%s3984_s8 + $0x110] sm:$0xff] %v2889_v38   ;;  %966 = vmatmul.bf16.gmra.mxu0 %v2653_v36  ;;  %1046 = vmatmul.bf16.gmra.mxu1 %v2669_v37  ;;  %v1630_v60 = vadd.f32 %v3974_v48, %v1498_v54  ;;  %v1662_v61 = vadd.f32 %v3974_v48, %v1530_v55 }
  0xfd   : > { %v1821_v52 = vmax.f32 %v1693_v47, 0.0  ;;  %3405 = vst [vmem:[%s3984_s8 + $0x190] sm:$0xff] %v2969_v40   ;;  %v1853_v53 = vmax.f32 %v1725_v49, 0.0  ;;  %1126 = vmatmul.bf16.gmra.mxu2 %v2685_v45  ;;  %1206 = vmatmul.bf16.gmra.mxu3 %v2701_v46 }
  0xfe   : > { %v1758_v8 = vmax.f32 %v1630_v60, 0.0  ;;  %v1790_v9 = vmax.f32 %v1662_v61, 0.0 }
  0xff   : > { %v3209_v56 = vpack.c.bf16 %v1821_v52, %v1820_v50  ;;  %v3289_v57 = vpack.c.bf16 %v1853_v53, %v1852_v51 }
 0x100   : > { %v1087_v58 = vpop.f32.mrf.mxu2  ;;  %v1167_v59 = vpop.f32.mrf.mxu3 }
 0x101   : > { %3452 = vst [vmem:[%s3999_s12 + $0x110] sm:$0xff] %v3209_v56   ;;  %v929_v62 = vpop.f32.mrf.mxu0  ;;  %v1009_v63 = vpop.f32.mrf.mxu1  ;;  %v1562_v4 = vmul.f32 %v3966_v43, %v1087_v58  ;;  %v1594_v5 = vmul.f32 %v3966_v43, %v1167_v59 }
 0x102   : > { %3468 = vst [vmem:[%s3999_s12 + $0x190] sm:$0xff] %v3289_v57   ;;  %v2734_v0 = vpack.c.bf16 %v929_v62, %v927_v42  ;;  %v1499_v1 = vmul.f32 %v3966_v43, %v929_v62  ;;  %v2814_v2 = vpack.c.bf16 %v1009_v63, %v1007_v44  ;;  %v1531_v3 = vmul.f32 %v3966_v43, %v1009_v63 }
 0x103   : > { %v1694_v12 = vadd.f32 %v3974_v48, %v1562_v4  ;;  %v1726_v13 = vadd.f32 %v3974_v48, %v1594_v5 }
 0x104   : > { %3358 = vst [vmem:[%s3984_s8 + $0x18] sm:$0xff] %v2734_v0   ;;  %v1631_v6 = vadd.f32 %v3974_v48, %v1499_v1  ;;  %v1663_v7 = vadd.f32 %v3974_v48, %v1531_v3  ;;  %v2655_v0 = vld [vmem:[%s3919_s15 + $0x68] sm:$0xff] }
 0x105   : > { %3374 = vst [vmem:[%s3984_s8 + $0x98] sm:$0xff] %v2814_v2   ;;  %v1822_v30 = vmax.f32 %v1694_v12, 0.0  ;;  %v1854_v31 = vmax.f32 %v1726_v13, 0.0  ;;  %v2671_v1 = vld [vmem:[%s3919_s15 + $0xe8] sm:$0xff] }
 0x106   : > { %v1759_v10 = vmax.f32 %v1631_v6, 0.0  ;;  %v1791_v11 = vmax.f32 %v1663_v7, 0.0 }
 0x108   : > { %v3054_v14 = vpack.c.bf16 %v1759_v10, %v1758_v8  ;;  %v3134_v15 = vpack.c.bf16 %v1791_v11, %v1790_v9  ;;  %v1089_v16 = vpop.f32.mrf.mxu2  ;;  %v1169_v17 = vpop.f32.mrf.mxu3  ;;  %v2687_v8 = vld [vmem:[%s3919_s15 + $0x168] sm:$0xff] }
 0x109   : > { %v2894_v20 = vpack.c.bf16 %v1089_v16, %v1087_v58  ;;  %v1563_v21 = vmul.f32 %v3966_v43, %v1089_v16  ;;  %v2974_v22 = vpack.c.bf16 %v1169_v17, %v1167_v59  ;;  %v1595_v23 = vmul.f32 %v3966_v43, %v1169_v17  ;;  %v932_v24 = vpop.f32.mrf.mxu0  ;;  %v1012_v25 = vpop.f32.mrf.mxu1  ;;  %v2703_v9 = vld [vmem:[%s3919_s15 + $0x1e8] sm:$0xff] }
 0x10a   : > { %3421 = vst [vmem:[%s3999_s12 + $0x18] sm:$0xff] %v3054_v14   ;;  %v1500_v34 = vmul.f32 %v3966_v43, %v932_v24  ;;  %v1532_v35 = vmul.f32 %v3966_v43, %v1012_v25 }
 0x10b   : > { %3437 = vst [vmem:[%s3999_s12 + $0x98] sm:$0xff] %v3134_v15   ;;  %v1695_v28 = vadd.f32 %v3974_v48, %v1563_v21  ;;  %v1727_v29 = vadd.f32 %v3974_v48, %v1595_v23 }
 0x10c   : > { %3390 = vst [vmem:[%s3984_s8 + $0x118] sm:$0xff] %v2894_v20   ;;  %971 = vmatmul.bf16.gmra.mxu0 %v2654_v18  ;;  %1051 = vmatmul.bf16.gmra.mxu1 %v2670_v19  ;;  %v1632_v40 = vadd.f32 %v3974_v48, %v1500_v34  ;;  %v1664_v41 = vadd.f32 %v3974_v48, %v1532_v35 }
 0x10d   : > { %v1823_v32 = vmax.f32 %v1695_v28, 0.0  ;;  %3406 = vst [vmem:[%s3984_s8 + $0x198] sm:$0xff] %v2974_v22   ;;  %v1855_v33 = vmax.f32 %v1727_v29, 0.0  ;;  %1131 = vmatmul.bf16.gmra.mxu2 %v2686_v26  ;;  %1211 = vmatmul.bf16.gmra.mxu3 %v2702_v27 }
 0x10e   : > { %v1760_v54 = vmax.f32 %v1632_v40, 0.0  ;;  %v1792_v55 = vmax.f32 %v1664_v41, 0.0 }
 0x10f   : > { %v3214_v36 = vpack.c.bf16 %v1823_v32, %v1822_v30  ;;  %v3294_v37 = vpack.c.bf16 %v1855_v33, %v1854_v31 }
 0x110   : > { %v1092_v38 = vpop.f32.mrf.mxu2  ;;  %v1172_v39 = vpop.f32.mrf.mxu3 }
 0x111   : > { %3453 = vst [vmem:[%s3999_s12 + $0x118] sm:$0xff] %v3214_v36   ;;  %v934_v42 = vpop.f32.mrf.mxu0  ;;  %v1014_v44 = vpop.f32.mrf.mxu1  ;;  %v1564_v50 = vmul.f32 %v3966_v43, %v1092_v38  ;;  %v1596_v51 = vmul.f32 %v3966_v43, %v1172_v39 }
 0x112   : > { %3469 = vst [vmem:[%s3999_s12 + $0x198] sm:$0xff] %v3294_v37   ;;  %v2739_v45 = vpack.c.bf16 %v934_v42, %v932_v24  ;;  %v1501_v46 = vmul.f32 %v3966_v43, %v934_v42  ;;  %v2819_v47 = vpack.c.bf16 %v1014_v44, %v1012_v25  ;;  %v1533_v49 = vmul.f32 %v3966_v43, %v1014_v44 }
 0x113   : > { %v1696_v58 = vadd.f32 %v3974_v48, %v1564_v50  ;;  %v1728_v59 = vadd.f32 %v3974_v48, %v1596_v51 }
 0x114   : > { %3359 = vst [vmem:[%s3984_s8 + $0x20] sm:$0xff] %v2739_v45   ;;  %v1633_v52 = vadd.f32 %v3974_v48, %v1501_v46  ;;  %v1665_v53 = vadd.f32 %v3974_v48, %v1533_v49  ;;  %v2656_v45 = vld [vmem:[%s3919_s15 + $0x70] sm:$0xff] }
 0x115   : > { %3375 = vst [vmem:[%s3984_s8 + $0xa0] sm:$0xff] %v2819_v47   ;;  %v1824_v12 = vmax.f32 %v1696_v58, 0.0  ;;  %v1856_v13 = vmax.f32 %v1728_v59, 0.0  ;;  %v2672_v46 = vld [vmem:[%s3919_s15 + $0xf0] sm:$0xff] }
 0x116   : > { %v1761_v56 = vmax.f32 %v1633_v52, 0.0  ;;  %v1793_v57 = vmax.f32 %v1665_v53, 0.0 }
 0x118   : > { %v3059_v60 = vpack.c.bf16 %v1761_v56, %v1760_v54  ;;  %v3139_v61 = vpack.c.bf16 %v1793_v57, %v1792_v55  ;;  %v1094_v62 = vpop.f32.mrf.mxu2  ;;  %v1174_v63 = vpop.f32.mrf.mxu3  ;;  %v2688_v54 = vld [vmem:[%s3919_s15 + $0x170] sm:$0xff] }
 0x119   : > { %v2899_v2 = vpack.c.bf16 %v1094_v62, %v1092_v38  ;;  %v1565_v3 = vmul.f32 %v3966_v43, %v1094_v62  ;;  %v2979_v4 = vpack.c.bf16 %v1174_v63, %v1172_v39  ;;  %v1597_v5 = vmul.f32 %v3966_v43, %v1174_v63  ;;  %v937_v6 = vpop.f32.mrf.mxu0  ;;  %v1017_v7 = vpop.f32.mrf.mxu1  ;;  %v2704_v55 = vld [vmem:[%s3919_s15 + $0x1f0] sm:$0xff] }
 0x11a   : > { %3422 = vst [vmem:[%s3999_s12 + $0x20] sm:$0xff] %v3059_v60   ;;  %v1502_v16 = vmul.f32 %v3966_v43, %v937_v6  ;;  %v1534_v17 = vmul.f32 %v3966_v43, %v1017_v7 }
 0x11b   : > { %3438 = vst [vmem:[%s3999_s12 + $0xa0] sm:$0xff] %v3139_v61   ;;  %v1697_v10 = vadd.f32 %v3974_v48, %v1565_v3  ;;  %v1729_v11 = vadd.f32 %v3974_v48, %v1597_v5 }
 0x11c   : > { %3391 = vst [vmem:[%s3984_s8 + $0x120] sm:$0xff] %v2899_v2   ;;  %976 = vmatmul.bf16.gmra.mxu0 %v2655_v0  ;;  %1056 = vmatmul.bf16.gmra.mxu1 %v2671_v1  ;;  %v1634_v22 = vadd.f32 %v3974_v48, %v1502_v16  ;;  %v1666_v23 = vadd.f32 %v3974_v48, %v1534_v17 }
 0x11d   : > { %v1825_v14 = vmax.f32 %v1697_v10, 0.0  ;;  %3407 = vst [vmem:[%s3984_s8 + $0x1a0] sm:$0xff] %v2979_v4   ;;  %v1857_v15 = vmax.f32 %v1729_v11, 0.0  ;;  %1136 = vmatmul.bf16.gmra.mxu2 %v2687_v8  ;;  %1216 = vmatmul.bf16.gmra.mxu3 %v2703_v9 }
 0x11e   : > { %v1762_v34 = vmax.f32 %v1634_v22, 0.0  ;;  %v1794_v35 = vmax.f32 %v1666_v23, 0.0 }
 0x11f   : > { %v3219_v18 = vpack.c.bf16 %v1825_v14, %v1824_v12  ;;  %v3299_v19 = vpack.c.bf16 %v1857_v15, %v1856_v13 }
 0x120   : > { %v1097_v20 = vpop.f32.mrf.mxu2  ;;  %v1177_v21 = vpop.f32.mrf.mxu3 }
 0x121   : > { %3454 = vst [vmem:[%s3999_s12 + $0x120] sm:$0xff] %v3219_v18   ;;  %v939_v24 = vpop.f32.mrf.mxu0  ;;  %v1019_v25 = vpop.f32.mrf.mxu1  ;;  %v1566_v30 = vmul.f32 %v3966_v43, %v1097_v20  ;;  %v1598_v31 = vmul.f32 %v3966_v43, %v1177_v21 }
 0x122   : > { %3470 = vst [vmem:[%s3999_s12 + $0x1a0] sm:$0xff] %v3299_v19   ;;  %v2744_v26 = vpack.c.bf16 %v939_v24, %v937_v6  ;;  %v1503_v27 = vmul.f32 %v3966_v43, %v939_v24  ;;  %v2824_v28 = vpack.c.bf16 %v1019_v25, %v1017_v7  ;;  %v1535_v29 = vmul.f32 %v3966_v43, %v1019_v25 }
 0x123   : > { %v1698_v38 = vadd.f32 %v3974_v48, %v1566_v30  ;;  %v1730_v39 = vadd.f32 %v3974_v48, %v1598_v31 }
 0x124   : > { %3360 = vst [vmem:[%s3984_s8 + $0x28] sm:$0xff] %v2744_v26   ;;  %v1635_v32 = vadd.f32 %v3974_v48, %v1503_v27  ;;  %v1667_v33 = vadd.f32 %v3974_v48, %v1535_v29  ;;  %v2657_v26 = vld [vmem:[%s3919_s15 + $0x78] sm:$0xff] }
 0x125   : > { %3376 = vst [vmem:[%s3984_s8 + $0xa8] sm:$0xff] %v2824_v28   ;;  %v1826_v58 = vmax.f32 %v1698_v38, 0.0  ;;  %v1858_v59 = vmax.f32 %v1730_v39, 0.0  ;;  %v2673_v27 = vld [vmem:[%s3919_s15 + $0xf8] sm:$0xff] }
 0x126   : > { %v1763_v36 = vmax.f32 %v1635_v32, 0.0  ;;  %v1795_v37 = vmax.f32 %v1667_v33, 0.0 }
 0x128   : > { %v3064_v40 = vpack.c.bf16 %v1763_v36, %v1762_v34  ;;  %v3144_v41 = vpack.c.bf16 %v1795_v37, %v1794_v35  ;;  %v1099_v42 = vpop.f32.mrf.mxu2  ;;  %v1179_v44 = vpop.f32.mrf.mxu3  ;;  %v2689_v34 = vld [vmem:[%s3919_s15 + $0x178] sm:$0xff] }
 0x129   : > { %v2904_v47 = vpack.c.bf16 %v1099_v42, %v1097_v20  ;;  %v1567_v49 = vmul.f32 %v3966_v43, %v1099_v42  ;;  %v2984_v50 = vpack.c.bf16 %v1179_v44, %v1177_v21  ;;  %v1599_v51 = vmul.f32 %v3966_v43, %v1179_v44  ;;  %v942_v52 = vpop.f32.mrf.mxu0  ;;  %v1022_v53 = vpop.f32.mrf.mxu1  ;;  %v2705_v35 = vld [vmem:[%s3919_s15 + $0x1f8] sm:$0xff] }
 0x12a   : > { %3423 = vst [vmem:[%s3999_s12 + $0x28] sm:$0xff] %v3064_v40   ;;  %v1504_v62 = vmul.f32 %v3966_v43, %v942_v52  ;;  %v1536_v63 = vmul.f32 %v3966_v43, %v1022_v53 }
 0x12b   : > { %3439 = vst [vmem:[%s3999_s12 + $0xa8] sm:$0xff] %v3144_v41   ;;  %v1699_v56 = vadd.f32 %v3974_v48, %v1567_v49  ;;  %v1731_v57 = vadd.f32 %v3974_v48, %v1599_v51 }
 0x12c   : > { %3392 = vst [vmem:[%s3984_s8 + $0x128] sm:$0xff] %v2904_v47   ;;  %981 = vmatmul.bf16.gmra.mxu0 %v2656_v45  ;;  %1061 = vmatmul.bf16.gmra.mxu1 %v2672_v46  ;;  %v1636_v4 = vadd.f32 %v3974_v48, %v1504_v62  ;;  %v1668_v5 = vadd.f32 %v3974_v48, %v1536_v63 }
 0x12d   : > { %v1827_v60 = vmax.f32 %v1699_v56, 0.0  ;;  %3408 = vst [vmem:[%s3984_s8 + $0x1a8] sm:$0xff] %v2984_v50   ;;  %v1859_v61 = vmax.f32 %v1731_v57, 0.0  ;;  %1141 = vmatmul.bf16.gmra.mxu2 %v2688_v54  ;;  %1221 = vmatmul.bf16.gmra.mxu3 %v2704_v55 }
 0x12e   : > { %v1764_v16 = vmax.f32 %v1636_v4, 0.0  ;;  %v1796_v17 = vmax.f32 %v1668_v5, 0.0 }
 0x12f   : > { %v3224_v0 = vpack.c.bf16 %v1827_v60, %v1826_v58  ;;  %v3304_v1 = vpack.c.bf16 %v1859_v61, %v1858_v59 }
 0x130   : > { %v1102_v2 = vpop.f32.mrf.mxu2  ;;  %v1182_v3 = vpop.f32.mrf.mxu3 }
 0x131   : > { %3455 = vst [vmem:[%s3999_s12 + $0x128] sm:$0xff] %v3224_v0   ;;  %v944_v6 = vpop.f32.mrf.mxu0  ;;  %v1024_v7 = vpop.f32.mrf.mxu1  ;;  %v1568_v12 = vmul.f32 %v3966_v43, %v1102_v2  ;;  %v1600_v13 = vmul.f32 %v3966_v43, %v1182_v3 }
 0x132   : > { %3471 = vst [vmem:[%s3999_s12 + $0x1a8] sm:$0xff] %v3304_v1   ;;  %v2749_v8 = vpack.c.bf16 %v944_v6, %v942_v52  ;;  %v1505_v9 = vmul.f32 %v3966_v43, %v944_v6  ;;  %v2829_v10 = vpack.c.bf16 %v1024_v7, %v1022_v53  ;;  %v1537_v11 = vmul.f32 %v3966_v43, %v1024_v7 }
 0x133   : > { %v1700_v20 = vadd.f32 %v3974_v48, %v1568_v12  ;;  %v1732_v21 = vadd.f32 %v3974_v48, %v1600_v13 }
 0x134   : > { %3361 = vst [vmem:[%s3984_s8 + $0x30] sm:$0xff] %v2749_v8   ;;  %v1637_v14 = vadd.f32 %v3974_v48, %v1505_v9  ;;  %v1669_v15 = vadd.f32 %v3974_v48, %v1537_v11 }
 0x135   : > { %3377 = vst [vmem:[%s3984_s8 + $0xb0] sm:$0xff] %v2829_v10   ;;  %v1828_v38 = vmax.f32 %v1700_v20, 0.0  ;;  %v1860_v39 = vmax.f32 %v1732_v21, 0.0 }
 0x136   : > { %v1765_v18 = vmax.f32 %v1637_v14, 0.0  ;;  %v1797_v19 = vmax.f32 %v1669_v15, 0.0 }
 0x138   : > { %v3069_v22 = vpack.c.bf16 %v1765_v18, %v1764_v16  ;;  %v3149_v23 = vpack.c.bf16 %v1797_v19, %v1796_v17  ;;  %v1104_v24 = vpop.f32.mrf.mxu2  ;;  %v1184_v25 = vpop.f32.mrf.mxu3 }
 0x139   : > { %v2909_v28 = vpack.c.bf16 %v1104_v24, %v1102_v2  ;;  %v1569_v29 = vmul.f32 %v3966_v43, %v1104_v24  ;;  %v2989_v30 = vpack.c.bf16 %v1184_v25, %v1182_v3  ;;  %v1601_v31 = vmul.f32 %v3966_v43, %v1184_v25  ;;  %v947_v32 = vpop.f32.mrf.mxu0  ;;  %v1027_v33 = vpop.f32.mrf.mxu1 }
 0x13a   : > { %3424 = vst [vmem:[%s3999_s12 + $0x30] sm:$0xff] %v3069_v22   ;;  %v1506_v42 = vmul.f32 %v3966_v43, %v947_v32  ;;  %v1538_v44 = vmul.f32 %v3966_v43, %v1027_v33 }
 0x13b   : > { %3440 = vst [vmem:[%s3999_s12 + $0xb0] sm:$0xff] %v3149_v23   ;;  %v1701_v36 = vadd.f32 %v3974_v48, %v1569_v29  ;;  %v1733_v37 = vadd.f32 %v3974_v48, %v1601_v31 }
 0x13c   : > { %3393 = vst [vmem:[%s3984_s8 + $0x130] sm:$0xff] %v2909_v28   ;;  %986 = vmatmul.bf16.gmra.mxu0 %v2657_v26  ;;  %1066 = vmatmul.bf16.gmra.mxu1 %v2673_v27  ;;  %v1638_v50 = vadd.f32 %v3974_v48, %v1506_v42  ;;  %v1670_v51 = vadd.f32 %v3974_v48, %v1538_v44 }
 0x13d   : > { %v1829_v40 = vmax.f32 %v1701_v36, 0.0  ;;  %3409 = vst [vmem:[%s3984_s8 + $0x1b0] sm:$0xff] %v2989_v30   ;;  %v1861_v41 = vmax.f32 %v1733_v37, 0.0  ;;  %1146 = vmatmul.bf16.gmra.mxu2 %v2689_v34  ;;  %1226 = vmatmul.bf16.gmra.mxu3 %v2705_v35 }
 0x13e   : > { %v1766_v62 = vmax.f32 %v1638_v50, 0.0  ;;  %v1798_v63 = vmax.f32 %v1670_v51, 0.0 }
 0x13f   : > { %v3229_v45 = vpack.c.bf16 %v1829_v40, %v1828_v38  ;;  %v3309_v46 = vpack.c.bf16 %v1861_v41, %v1860_v39 }
 0x140   : > { %v1107_v47 = vpop.f32.mrf.mxu2  ;;  %v1187_v49 = vpop.f32.mrf.mxu3 }
 0x141   : > { %3456 = vst [vmem:[%s3999_s12 + $0x130] sm:$0xff] %v3229_v45   ;;  %v949_v52 = vpop.f32.mrf.mxu0  ;;  %v1029_v53 = vpop.f32.mrf.mxu1  ;;  %v1570_v58 = vmul.f32 %v3966_v43, %v1107_v47  ;;  %v1602_v59 = vmul.f32 %v3966_v43, %v1187_v49 }
 0x142   : > { %3472 = vst [vmem:[%s3999_s12 + $0x1b0] sm:$0xff] %v3309_v46   ;;  %v2754_v54 = vpack.c.bf16 %v949_v52, %v947_v32  ;;  %v1507_v55 = vmul.f32 %v3966_v43, %v949_v52  ;;  %v2834_v56 = vpack.c.bf16 %v1029_v53, %v1027_v33  ;;  %v1539_v57 = vmul.f32 %v3966_v43, %v1029_v53 }
 0x143   : > { %v1702_v2 = vadd.f32 %v3974_v48, %v1570_v58  ;;  %v1734_v3 = vadd.f32 %v3974_v48, %v1602_v59 }
 0x144   : > { %3362 = vst [vmem:[%s3984_s8 + $0x38] sm:$0xff] %v2754_v54   ;;  %v1639_v60 = vadd.f32 %v3974_v48, %v1507_v55  ;;  %v1671_v61 = vadd.f32 %v3974_v48, %v1539_v57 }
 0x145   : > { %3378 = vst [vmem:[%s3984_s8 + $0xb8] sm:$0xff] %v2834_v56   ;;  %v1830_v16 = vmax.f32 %v1702_v2, 0.0  ;;  %v1862_v17 = vmax.f32 %v1734_v3, 0.0 }
 0x146   : > { %v1767_v0 = vmax.f32 %v1639_v60, 0.0  ;;  %v1799_v1 = vmax.f32 %v1671_v61, 0.0 }
 0x148   : > { %v3074_v4 = vpack.c.bf16 %v1767_v0, %v1766_v62  ;;  %v3154_v5 = vpack.c.bf16 %v1799_v1, %v1798_v63  ;;  %v1109_v6 = vpop.f32.mrf.mxu2  ;;  %v1189_v7 = vpop.f32.mrf.mxu3 }
 0x149   : > { %v2914_v8 = vpack.c.bf16 %v1109_v6, %v1107_v47  ;;  %v1571_v9 = vmul.f32 %v3966_v43, %v1109_v6  ;;  %v2994_v10 = vpack.c.bf16 %v1189_v7, %v1187_v49  ;;  %v1603_v11 = vmul.f32 %v3966_v43, %v1189_v7  ;;  %v952_v12 = vpop.f32.mrf.mxu0  ;;  %v1032_v13 = vpop.f32.mrf.mxu1 }
 0x14a   : > { %3425 = vst [vmem:[%s3999_s12 + $0x38] sm:$0xff] %v3074_v4   ;;  %v1508_v20 = vmul.f32 %v3966_v43, %v952_v12  ;;  %v1540_v21 = vmul.f32 %v3966_v43, %v1032_v13 }
 0x14b   : > { %3441 = vst [vmem:[%s3999_s12 + $0xb8] sm:$0xff] %v3154_v5   ;;  %v1703_v14 = vadd.f32 %v3974_v48, %v1571_v9  ;;  %v1735_v15 = vadd.f32 %v3974_v48, %v1603_v11 }
 0x14c   : > { %3394 = vst [vmem:[%s3984_s8 + $0x138] sm:$0xff] %v2914_v8   ;;  %v1640_v26 = vadd.f32 %v3974_v48, %v1508_v20  ;;  %v1672_v27 = vadd.f32 %v3974_v48, %v1540_v21 }
 0x14d   : > { %v1831_v18 = vmax.f32 %v1703_v14, 0.0  ;;  %3410 = vst [vmem:[%s3984_s8 + $0x1b8] sm:$0xff] %v2994_v10   ;;  %v1863_v19 = vmax.f32 %v1735_v15, 0.0 }
 0x14e   : > { %v1768_v38 = vmax.f32 %v1640_v26, 0.0  ;;  %v1800_v39 = vmax.f32 %v1672_v27, 0.0 }
 0x14f   : > { %v3234_v22 = vpack.c.bf16 %v1831_v18, %v1830_v16  ;;  %v3314_v23 = vpack.c.bf16 %v1863_v19, %v1862_v17 }
 0x150   : > { %v1112_v24 = vpop.f32.mrf.mxu2  ;;  %v1192_v25 = vpop.f32.mrf.mxu3 }
 0x151   : > { %3457 = vst [vmem:[%s3999_s12 + $0x138] sm:$0xff] %v3234_v22   ;;  %v954_v28 = vpop.f32.mrf.mxu0  ;;  %v1034_v29 = vpop.f32.mrf.mxu1  ;;  %v1572_v34 = vmul.f32 %v3966_v43, %v1112_v24  ;;  %v1604_v35 = vmul.f32 %v3966_v43, %v1192_v25 }
 0x152   : > { %3473 = vst [vmem:[%s3999_s12 + $0x1b8] sm:$0xff] %v3314_v23   ;;  %v2759_v30 = vpack.c.bf16 %v954_v28, %v952_v12  ;;  %v1509_v31 = vmul.f32 %v3966_v43, %v954_v28  ;;  %v2839_v32 = vpack.c.bf16 %v1034_v29, %v1032_v13  ;;  %v1541_v33 = vmul.f32 %v3966_v43, %v1034_v29  ;;  %v4235_v13 = vld [vmem:[%s4473_s2] ss:$0 sm:$0xff] }
 0x153   : > { %v1704_v42 = vadd.f32 %v3974_v48, %v1572_v34  ;;  %v1736_v44 = vadd.f32 %v3974_v48, %v1604_v35 }
 0x154   : > { %3363 = vst [vmem:[%s3984_s8 + $0x40] sm:$0xff] %v2759_v30   ;;  %v1641_v36 = vadd.f32 %v3974_v48, %v1509_v31  ;;  %v1673_v37 = vadd.f32 %v3974_v48, %v1541_v33 }
 0x155   : > { %3379 = vst [vmem:[%s3984_s8 + $0xc0] sm:$0xff] %v2839_v32   ;;  %v1832_v58 = vmax.f32 %v1704_v42, 0.0  ;;  %v1864_v59 = vmax.f32 %v1736_v44, 0.0 }
 0x156   : > { %v1769_v40 = vmax.f32 %v1641_v36, 0.0  ;;  %v1801_v41 = vmax.f32 %v1673_v37, 0.0 }
 0x158   : > { %v3079_v45 = vpack.c.bf16 %v1769_v40, %v1768_v38  ;;  %v3159_v46 = vpack.c.bf16 %v1801_v41, %v1800_v39  ;;  %v1114_v47 = vpop.f32.mrf.mxu2  ;;  %v1194_v49 = vpop.f32.mrf.mxu3 }
 0x159   : > { %v2919_v50 = vpack.c.bf16 %v1114_v47, %v1112_v24  ;;  %v1573_v51 = vmul.f32 %v3966_v43, %v1114_v47  ;;  %v2999_v52 = vpack.c.bf16 %v1194_v49, %v1192_v25  ;;  %v1605_v53 = vmul.f32 %v3966_v43, %v1194_v49  ;;  %v957_v54 = vpop.f32.mrf.mxu0  ;;  %v1037_v55 = vpop.f32.mrf.mxu1 }
 0x15a   : > { %3426 = vst [vmem:[%s3999_s12 + $0x40] sm:$0xff] %v3079_v45   ;;  %v1510_v62 = vmul.f32 %v3966_v43, %v957_v54  ;;  %v1542_v63 = vmul.f32 %v3966_v43, %v1037_v55 }
 0x15b   : > { %3442 = vst [vmem:[%s3999_s12 + $0xc0] sm:$0xff] %v3159_v46   ;;  %v1705_v56 = vadd.f32 %v3974_v48, %v1573_v51  ;;  %v1737_v57 = vadd.f32 %v3974_v48, %v1605_v53 }
 0x15c   : > { %3395 = vst [vmem:[%s3984_s8 + $0x140] sm:$0xff] %v2919_v50   ;;  %v1642_v4 = vadd.f32 %v3974_v48, %v1510_v62  ;;  %v1674_v5 = vadd.f32 %v3974_v48, %v1542_v63 }
 0x15d   : > { %v1833_v60 = vmax.f32 %v1705_v56, 0.0  ;;  %3411 = vst [vmem:[%s3984_s8 + $0x1c0] sm:$0xff] %v2999_v52   ;;  %v1865_v61 = vmax.f32 %v1737_v57, 0.0 }
 0x15e   : > { %v1770_v17 = vmax.f32 %v1642_v4, 0.0  ;;  %v1802_v18 = vmax.f32 %v1674_v5, 0.0 }
 0x15f   : > { %v3239_v0 = vpack.c.bf16 %v1833_v60, %v1832_v58  ;;  %v3319_v1 = vpack.c.bf16 %v1865_v61, %v1864_v59 }
 0x160   : > { %v1117_v2 = vpop.f32.mrf.mxu2  ;;  %v1197_v3 = vpop.f32.mrf.mxu3 }
 0x161   : > { %3458 = vst [vmem:[%s3999_s12 + $0x140] sm:$0xff] %v3239_v0   ;;  %v959_v6 = vpop.f32.mrf.mxu0  ;;  %v1039_v7 = vpop.f32.mrf.mxu1  ;;  %v1574_v12 = vmul.f32 %v3966_v43, %v1117_v2  ;;  %v1606_v14 = vmul.f32 %v4235_v13, %v1197_v3 }
 0x162   : > { %3474 = vst [vmem:[%s3999_s12 + $0x1c0] sm:$0xff] %v3319_v1   ;;  %v2764_v8 = vpack.c.bf16 %v959_v6, %v957_v54  ;;  %v1511_v9 = vmul.f32 %v3966_v43, %v959_v6  ;;  %v2844_v10 = vpack.c.bf16 %v1039_v7, %v1037_v55  ;;  %v1543_v11 = vmul.f32 %v3966_v43, %v1039_v7  ;;  %v4245_v43 = vld [vmem:[%s4474_s3] ss:$0 sm:$0xff] }
 0x163   : > { %v1706_v21 = vadd.f32 %v4245_v43, %v1574_v12  ;;  %v1738_v22 = vadd.f32 %v4245_v43, %v1606_v14 }
 0x164   : > { %3364 = vst [vmem:[%s3984_s8 + $0x48] sm:$0xff] %v2764_v8   ;;  %v1643_v15 = vadd.f32 %v3974_v48, %v1511_v9  ;;  %v1675_v16 = vadd.f32 %v3974_v48, %v1543_v11 }
 0x165   : > { %3380 = vst [vmem:[%s3984_s8 + $0xc8] sm:$0xff] %v2844_v10   ;;  %v1834_v34 = vmax.f32 %v1706_v21, 0.0  ;;  %v1866_v35 = vmax.f32 %v1738_v22, 0.0 }
 0x166   : > { %v1771_v19 = vmax.f32 %v1643_v15, 0.0  ;;  %v1803_v20 = vmax.f32 %v1675_v16, 0.0 }
 0x168   : > { %v3084_v23 = vpack.c.bf16 %v1771_v19, %v1770_v17  ;;  %v3164_v24 = vpack.c.bf16 %v1803_v20, %v1802_v18  ;;  %v1119_v48 = vpop.f32.mrf.mxu2  ;;  %v1199_v25 = vpop.f32.mrf.mxu3 }
 0x169   : > { %v2924_v26 = vpack.c.bf16 %v1119_v48, %v1117_v2  ;;  %v1575_v27 = vmul.f32 %v4235_v13, %v1119_v48  ;;  %v3004_v28 = vpack.c.bf16 %v1199_v25, %v1197_v3  ;;  %v1607_v29 = vmul.f32 %v4235_v13, %v1199_v25  ;;  %v962_v30 = vpop.f32.mrf.mxu0  ;;  %v1042_v31 = vpop.f32.mrf.mxu1 }
 0x16a   : > { %3427 = vst [vmem:[%s3999_s12 + $0x48] sm:$0xff] %v3084_v23   ;;  %v1512_v38 = vmul.f32 %v4235_v13, %v962_v30  ;;  %v1544_v39 = vmul.f32 %v4235_v13, %v1042_v31 }
 0x16b   : > { %3443 = vst [vmem:[%s3999_s12 + $0xc8] sm:$0xff] %v3164_v24   ;;  %v1707_v32 = vadd.f32 %v4245_v43, %v1575_v27  ;;  %v1739_v33 = vadd.f32 %v4245_v43, %v1607_v29 }
 0x16c   : > { %3396 = vst [vmem:[%s3984_s8 + $0x148] sm:$0xff] %v2924_v26   ;;  %v1644_v45 = vadd.f32 %v4245_v43, %v1512_v38  ;;  %v1676_v46 = vadd.f32 %v4245_v43, %v1544_v39 }
 0x16d   : > { %v1835_v36 = vmax.f32 %v1707_v32, 0.0  ;;  %3412 = vst [vmem:[%s3984_s8 + $0x1c8] sm:$0xff] %v3004_v28   ;;  %v1867_v37 = vmax.f32 %v1739_v33, 0.0 }
 0x16e   : > { %v1772_v58 = vmax.f32 %v1644_v45, 0.0  ;;  %v1804_v59 = vmax.f32 %v1676_v46, 0.0 }
 0x16f   : > { %v3244_v40 = vpack.c.bf16 %v1835_v36, %v1834_v34  ;;  %v3324_v41 = vpack.c.bf16 %v1867_v37, %v1866_v35 }
 0x170   : > { %v1122_v42 = vpop.f32.mrf.mxu2  ;;  %v1202_v44 = vpop.f32.mrf.mxu3 }
 0x171   : > { %3459 = vst [vmem:[%s3999_s12 + $0x148] sm:$0xff] %v3244_v40   ;;  %v964_v47 = vpop.f32.mrf.mxu0  ;;  %v1044_v49 = vpop.f32.mrf.mxu1  ;;  %v1576_v54 = vmul.f32 %v4235_v13, %v1122_v42  ;;  %v1608_v55 = vmul.f32 %v4235_v13, %v1202_v44 }
 0x172   : > { %3475 = vst [vmem:[%s3999_s12 + $0x1c8] sm:$0xff] %v3324_v41   ;;  %v2769_v50 = vpack.c.bf16 %v964_v47, %v962_v30  ;;  %v1513_v51 = vmul.f32 %v4235_v13, %v964_v47  ;;  %v2849_v52 = vpack.c.bf16 %v1044_v49, %v1042_v31  ;;  %v1545_v53 = vmul.f32 %v4235_v13, %v1044_v49 }
 0x173   : > { %v1708_v62 = vadd.f32 %v4245_v43, %v1576_v54  ;;  %v1740_v63 = vadd.f32 %v4245_v43, %v1608_v55 }
 0x174   : > { %3365 = vst [vmem:[%s3984_s8 + $0x50] sm:$0xff] %v2769_v50   ;;  %v1645_v56 = vadd.f32 %v4245_v43, %v1513_v51  ;;  %v1677_v57 = vadd.f32 %v4245_v43, %v1545_v53 }
 0x175   : > { %3381 = vst [vmem:[%s3984_s8 + $0xd0] sm:$0xff] %v2849_v52   ;;  %v1836_v12 = vmax.f32 %v1708_v62, 0.0  ;;  %v1868_v14 = vmax.f32 %v1740_v63, 0.0 }
 0x176   : > { %v1773_v60 = vmax.f32 %v1645_v56, 0.0  ;;  %v1805_v61 = vmax.f32 %v1677_v57, 0.0 }
 0x178   : > { %v3089_v0 = vpack.c.bf16 %v1773_v60, %v1772_v58  ;;  %v3169_v1 = vpack.c.bf16 %v1805_v61, %v1804_v59  ;;  %v1124_v2 = vpop.f32.mrf.mxu2  ;;  %v1204_v3 = vpop.f32.mrf.mxu3 }
 0x179   : > { %v2929_v4 = vpack.c.bf16 %v1124_v2, %v1122_v42  ;;  %v1577_v5 = vmul.f32 %v4235_v13, %v1124_v2  ;;  %v3009_v6 = vpack.c.bf16 %v1204_v3, %v1202_v44  ;;  %v1609_v7 = vmul.f32 %v4235_v13, %v1204_v3  ;;  %v967_v8 = vpop.f32.mrf.mxu0  ;;  %v1047_v9 = vpop.f32.mrf.mxu1 }
 0x17a   : > { %3428 = vst [vmem:[%s3999_s12 + $0x50] sm:$0xff] %v3089_v0   ;;  %v1514_v17 = vmul.f32 %v4235_v13, %v967_v8  ;;  %v1546_v18 = vmul.f32 %v4235_v13, %v1047_v9 }
 0x17b   : > { %3444 = vst [vmem:[%s3999_s12 + $0xd0] sm:$0xff] %v3169_v1   ;;  %v1709_v10 = vadd.f32 %v4245_v43, %v1577_v5  ;;  %v1741_v11 = vadd.f32 %v4245_v43, %v1609_v7 }
 0x17c   : > { %3397 = vst [vmem:[%s3984_s8 + $0x150] sm:$0xff] %v2929_v4   ;;  %v1646_v23 = vadd.f32 %v4245_v43, %v1514_v17  ;;  %v1678_v24 = vadd.f32 %v4245_v43, %v1546_v18 }
 0x17d   : > { %v1837_v15 = vmax.f32 %v1709_v10, 0.0  ;;  %3413 = vst [vmem:[%s3984_s8 + $0x1d0] sm:$0xff] %v3009_v6   ;;  %v1869_v16 = vmax.f32 %v1741_v11, 0.0 }
 0x17e   : > { %v1774_v34 = vmax.f32 %v1646_v23, 0.0  ;;  %v1806_v35 = vmax.f32 %v1678_v24, 0.0 }
 0x17f   : > { %v3249_v19 = vpack.c.bf16 %v1837_v15, %v1836_v12  ;;  %v3329_v20 = vpack.c.bf16 %v1869_v16, %v1868_v14 }
 0x180   : > { %v1127_v21 = vpop.f32.mrf.mxu2  ;;  %v1207_v22 = vpop.f32.mrf.mxu3 }
 0x181   : > { %3460 = vst [vmem:[%s3999_s12 + $0x150] sm:$0xff] %v3249_v19   ;;  %v969_v48 = vpop.f32.mrf.mxu0  ;;  %v1049_v25 = vpop.f32.mrf.mxu1  ;;  %v1578_v30 = vmul.f32 %v4235_v13, %v1127_v21  ;;  %v1610_v31 = vmul.f32 %v4235_v13, %v1207_v22 }
 0x182   : > { %3476 = vst [vmem:[%s3999_s12 + $0x1d0] sm:$0xff] %v3329_v20   ;;  %v2774_v26 = vpack.c.bf16 %v969_v48, %v967_v8  ;;  %v1515_v27 = vmul.f32 %v4235_v13, %v969_v48  ;;  %v2854_v28 = vpack.c.bf16 %v1049_v25, %v1047_v9  ;;  %v1547_v29 = vmul.f32 %v4235_v13, %v1049_v25 }
 0x183   : > { %v1710_v38 = vadd.f32 %v4245_v43, %v1578_v30  ;;  %v1742_v39 = vadd.f32 %v4245_v43, %v1610_v31 }
 0x184   : > { %3366 = vst [vmem:[%s3984_s8 + $0x58] sm:$0xff] %v2774_v26   ;;  %v1647_v32 = vadd.f32 %v4245_v43, %v1515_v27  ;;  %v1679_v33 = vadd.f32 %v4245_v43, %v1547_v29 }
 0x185   : > { %3382 = vst [vmem:[%s3984_s8 + $0xd8] sm:$0xff] %v2854_v28   ;;  %v1838_v54 = vmax.f32 %v1710_v38, 0.0  ;;  %v1870_v55 = vmax.f32 %v1742_v39, 0.0 }
 0x186   : > { %v1775_v36 = vmax.f32 %v1647_v32, 0.0  ;;  %v1807_v37 = vmax.f32 %v1679_v33, 0.0 }
 0x188   : > { %v3094_v40 = vpack.c.bf16 %v1775_v36, %v1774_v34  ;;  %v3174_v41 = vpack.c.bf16 %v1807_v37, %v1806_v35  ;;  %v1129_v42 = vpop.f32.mrf.mxu2  ;;  %v1209_v44 = vpop.f32.mrf.mxu3 }
 0x189   : > { %v2934_v45 = vpack.c.bf16 %v1129_v42, %v1127_v21  ;;  %v1579_v46 = vmul.f32 %v4235_v13, %v1129_v42  ;;  %v3014_v47 = vpack.c.bf16 %v1209_v44, %v1207_v22  ;;  %v1611_v49 = vmul.f32 %v4235_v13, %v1209_v44  ;;  %v972_v50 = vpop.f32.mrf.mxu0  ;;  %v1052_v51 = vpop.f32.mrf.mxu1 }
 0x18a   : > { %3429 = vst [vmem:[%s3999_s12 + $0x58] sm:$0xff] %v3094_v40   ;;  %v1516_v58 = vmul.f32 %v4235_v13, %v972_v50  ;;  %v1548_v59 = vmul.f32 %v4235_v13, %v1052_v51 }
 0x18b   : > { %3445 = vst [vmem:[%s3999_s12 + $0xd8] sm:$0xff] %v3174_v41   ;;  %v1711_v52 = vadd.f32 %v4245_v43, %v1579_v46  ;;  %v1743_v53 = vadd.f32 %v4245_v43, %v1611_v49 }
 0x18c   : > { %3398 = vst [vmem:[%s3984_s8 + $0x158] sm:$0xff] %v2934_v45   ;;  %v1648_v0 = vadd.f32 %v4245_v43, %v1516_v58  ;;  %v1680_v1 = vadd.f32 %v4245_v43, %v1548_v59 }
 0x18d   : > { %v1839_v56 = vmax.f32 %v1711_v52, 0.0  ;;  %3414 = vst [vmem:[%s3984_s8 + $0x1d8] sm:$0xff] %v3014_v47   ;;  %v1871_v57 = vmax.f32 %v1743_v53, 0.0 }
 0x18e   : > { %v1776_v12 = vmax.f32 %v1648_v0, 0.0  ;;  %v1808_v14 = vmax.f32 %v1680_v1, 0.0 }
 0x18f   : > { %v3254_v60 = vpack.c.bf16 %v1839_v56, %v1838_v54  ;;  %v3334_v61 = vpack.c.bf16 %v1871_v57, %v1870_v55 }
 0x190   : > { %v1132_v62 = vpop.f32.mrf.mxu2  ;;  %v1212_v63 = vpop.f32.mrf.mxu3 }
 0x191   : > { %3461 = vst [vmem:[%s3999_s12 + $0x158] sm:$0xff] %v3254_v60   ;;  %v974_v2 = vpop.f32.mrf.mxu0  ;;  %v1054_v3 = vpop.f32.mrf.mxu1  ;;  %v1580_v8 = vmul.f32 %v4235_v13, %v1132_v62  ;;  %v1612_v9 = vmul.f32 %v4235_v13, %v1212_v63 }
 0x192   : > { %3477 = vst [vmem:[%s3999_s12 + $0x1d8] sm:$0xff] %v3334_v61   ;;  %v2779_v4 = vpack.c.bf16 %v974_v2, %v972_v50  ;;  %v1517_v5 = vmul.f32 %v4235_v13, %v974_v2  ;;  %v2859_v6 = vpack.c.bf16 %v1054_v3, %v1052_v51  ;;  %v1549_v7 = vmul.f32 %v4235_v13, %v1054_v3 }
 0x193   : > { %v1712_v17 = vadd.f32 %v4245_v43, %v1580_v8  ;;  %v1744_v18 = vadd.f32 %v4245_v43, %v1612_v9 }
 0x194   : > { %3367 = vst [vmem:[%s3984_s8 + $0x60] sm:$0xff] %v2779_v4   ;;  %v1649_v10 = vadd.f32 %v4245_v43, %v1517_v5  ;;  %v1681_v11 = vadd.f32 %v4245_v43, %v1549_v7 }
 0x195   : > { %3383 = vst [vmem:[%s3984_s8 + $0xe0] sm:$0xff] %v2859_v6   ;;  %v1840_v30 = vmax.f32 %v1712_v17, 0.0  ;;  %v1872_v31 = vmax.f32 %v1744_v18, 0.0 }
 0x196   : > { %v1777_v15 = vmax.f32 %v1649_v10, 0.0  ;;  %v1809_v16 = vmax.f32 %v1681_v11, 0.0 }
 0x198   : > { %v3099_v19 = vpack.c.bf16 %v1777_v15, %v1776_v12  ;;  %v3179_v20 = vpack.c.bf16 %v1809_v16, %v1808_v14  ;;  %v1134_v21 = vpop.f32.mrf.mxu2  ;;  %v1214_v22 = vpop.f32.mrf.mxu3 }
 0x199   : > { %v2939_v23 = vpack.c.bf16 %v1134_v21, %v1132_v62  ;;  %v1581_v24 = vmul.f32 %v4235_v13, %v1134_v21  ;;  %v3019_v48 = vpack.c.bf16 %v1214_v22, %v1212_v63  ;;  %v1613_v25 = vmul.f32 %v4235_v13, %v1214_v22  ;;  %v977_v26 = vpop.f32.mrf.mxu0  ;;  %v1057_v27 = vpop.f32.mrf.mxu1 }
 0x19a   : > { %3430 = vst [vmem:[%s3999_s12 + $0x60] sm:$0xff] %v3099_v19   ;;  %v1518_v34 = vmul.f32 %v4235_v13, %v977_v26  ;;  %v1550_v35 = vmul.f32 %v4235_v13, %v1057_v27 }
 0x19b   : > { %3446 = vst [vmem:[%s3999_s12 + $0xe0] sm:$0xff] %v3179_v20   ;;  %v1713_v28 = vadd.f32 %v4245_v43, %v1581_v24  ;;  %v1745_v29 = vadd.f32 %v4245_v43, %v1613_v25 }
 0x19c   : > { %3399 = vst [vmem:[%s3984_s8 + $0x160] sm:$0xff] %v2939_v23   ;;  %v1650_v40 = vadd.f32 %v4245_v43, %v1518_v34  ;;  %v1682_v41 = vadd.f32 %v4245_v43, %v1550_v35 }
 0x19d   : > { %v1841_v32 = vmax.f32 %v1713_v28, 0.0  ;;  %3415 = vst [vmem:[%s3984_s8 + $0x1e0] sm:$0xff] %v3019_v48   ;;  %v1873_v33 = vmax.f32 %v1745_v29, 0.0 }
 0x19e   : > { %v1778_v54 = vmax.f32 %v1650_v40, 0.0  ;;  %v1810_v55 = vmax.f32 %v1682_v41, 0.0 }
 0x19f   : > { %v3259_v36 = vpack.c.bf16 %v1841_v32, %v1840_v30  ;;  %v3339_v37 = vpack.c.bf16 %v1873_v33, %v1872_v31 }
 0x1a0   : > { %v1137_v38 = vpop.f32.mrf.mxu2  ;;  %v1217_v39 = vpop.f32.mrf.mxu3 }
 0x1a1   : > { %3462 = vst [vmem:[%s3999_s12 + $0x160] sm:$0xff] %v3259_v36   ;;  %v979_v42 = vpop.f32.mrf.mxu0  ;;  %v1059_v44 = vpop.f32.mrf.mxu1  ;;  %v1582_v50 = vmul.f32 %v4235_v13, %v1137_v38  ;;  %v1614_v51 = vmul.f32 %v4235_v13, %v1217_v39 }
 0x1a2   : > { %3478 = vst [vmem:[%s3999_s12 + $0x1e0] sm:$0xff] %v3339_v37   ;;  %v2784_v45 = vpack.c.bf16 %v979_v42, %v977_v26  ;;  %v1519_v46 = vmul.f32 %v4235_v13, %v979_v42  ;;  %v2864_v47 = vpack.c.bf16 %v1059_v44, %v1057_v27  ;;  %v1551_v49 = vmul.f32 %v4235_v13, %v1059_v44 }
 0x1a3   : > { %v1714_v58 = vadd.f32 %v4245_v43, %v1582_v50  ;;  %v1746_v59 = vadd.f32 %v4245_v43, %v1614_v51 }
 0x1a4   : > { %3368 = vst [vmem:[%s3984_s8 + $0x68] sm:$0xff] %v2784_v45   ;;  %v1651_v52 = vadd.f32 %v4245_v43, %v1519_v46  ;;  %v1683_v53 = vadd.f32 %v4245_v43, %v1551_v49 }
 0x1a5   : > { %3384 = vst [vmem:[%s3984_s8 + $0xe8] sm:$0xff] %v2864_v47   ;;  %v1842_v8 = vmax.f32 %v1714_v58, 0.0  ;;  %v1874_v9 = vmax.f32 %v1746_v59, 0.0 }
 0x1a6   : > { %v1779_v56 = vmax.f32 %v1651_v52, 0.0  ;;  %v1811_v57 = vmax.f32 %v1683_v53, 0.0 }
 0x1a8   : > { %v3104_v60 = vpack.c.bf16 %v1779_v56, %v1778_v54  ;;  %v3184_v61 = vpack.c.bf16 %v1811_v57, %v1810_v55  ;;  %v1139_v62 = vpop.f32.mrf.mxu2  ;;  %v1219_v63 = vpop.f32.mrf.mxu3 }
 0x1a9   : > { %v2944_v0 = vpack.c.bf16 %v1139_v62, %v1137_v38  ;;  %v1583_v1 = vmul.f32 %v4235_v13, %v1139_v62  ;;  %v3024_v2 = vpack.c.bf16 %v1219_v63, %v1217_v39  ;;  %v1615_v3 = vmul.f32 %v4235_v13, %v1219_v63  ;;  %v982_v4 = vpop.f32.mrf.mxu0  ;;  %v1062_v5 = vpop.f32.mrf.mxu1 }
 0x1aa   : > { %3431 = vst [vmem:[%s3999_s12 + $0x68] sm:$0xff] %v3104_v60   ;;  %v1520_v12 = vmul.f32 %v4235_v13, %v982_v4  ;;  %v1552_v14 = vmul.f32 %v4235_v13, %v1062_v5 }
 0x1ab   : > { %3447 = vst [vmem:[%s3999_s12 + $0xe8] sm:$0xff] %v3184_v61   ;;  %v1715_v6 = vadd.f32 %v4245_v43, %v1583_v1  ;;  %v1747_v7 = vadd.f32 %v4245_v43, %v1615_v3 }
 0x1ac   : > { %3400 = vst [vmem:[%s3984_s8 + $0x168] sm:$0xff] %v2944_v0   ;;  %v1652_v19 = vadd.f32 %v4245_v43, %v1520_v12  ;;  %v1684_v20 = vadd.f32 %v4245_v43, %v1552_v14 }
 0x1ad   : > { %v1843_v10 = vmax.f32 %v1715_v6, 0.0  ;;  %3416 = vst [vmem:[%s3984_s8 + $0x1e8] sm:$0xff] %v3024_v2   ;;  %v1875_v11 = vmax.f32 %v1747_v7, 0.0 }
 0x1ae   : > { %v1780_v30 = vmax.f32 %v1652_v19, 0.0  ;;  %v1812_v31 = vmax.f32 %v1684_v20, 0.0 }
 0x1af   : > { %v3264_v15 = vpack.c.bf16 %v1843_v10, %v1842_v8  ;;  %v3344_v16 = vpack.c.bf16 %v1875_v11, %v1874_v9 }
 0x1b0   : > { %v1142_v17 = vpop.f32.mrf.mxu2  ;;  %v1222_v18 = vpop.f32.mrf.mxu3 }
 0x1b1   : > { %3463 = vst [vmem:[%s3999_s12 + $0x168] sm:$0xff] %v3264_v15   ;;  %v984_v21 = vpop.f32.mrf.mxu0  ;;  %v1064_v22 = vpop.f32.mrf.mxu1  ;;  %v1584_v26 = vmul.f32 %v4235_v13, %v1142_v17  ;;  %v1616_v27 = vmul.f32 %v4235_v13, %v1222_v18 }
 0x1b2   : > { %3479 = vst [vmem:[%s3999_s12 + $0x1e8] sm:$0xff] %v3344_v16   ;;  %v2789_v23 = vpack.c.bf16 %v984_v21, %v982_v4  ;;  %v1521_v24 = vmul.f32 %v4235_v13, %v984_v21  ;;  %v2869_v48 = vpack.c.bf16 %v1064_v22, %v1062_v5  ;;  %v1553_v25 = vmul.f32 %v4235_v13, %v1064_v22 }
 0x1b3   : > { %v1716_v34 = vadd.f32 %v4245_v43, %v1584_v26  ;;  %v1748_v35 = vadd.f32 %v4245_v43, %v1616_v27 }
 0x1b4   : > { %3369 = vst [vmem:[%s3984_s8 + $0x70] sm:$0xff] %v2789_v23   ;;  %v1653_v28 = vadd.f32 %v4245_v43, %v1521_v24  ;;  %v1685_v29 = vadd.f32 %v4245_v43, %v1553_v25 }
 0x1b5   : > { %3385 = vst [vmem:[%s3984_s8 + $0xf0] sm:$0xff] %v2869_v48   ;;  %v1844_v50 = vmax.f32 %v1716_v34, 0.0  ;;  %v1876_v51 = vmax.f32 %v1748_v35, 0.0 }
 0x1b6   : > { %v1781_v32 = vmax.f32 %v1653_v28, 0.0  ;;  %v1813_v33 = vmax.f32 %v1685_v29, 0.0 }
 0x1b8   : > { %v3109_v36 = vpack.c.bf16 %v1781_v32, %v1780_v30  ;;  %v3189_v37 = vpack.c.bf16 %v1813_v33, %v1812_v31  ;;  %v1144_v38 = vpop.f32.mrf.mxu2  ;;  %v1224_v39 = vpop.f32.mrf.mxu3 }
 0x1b9   : > { %v2949_v40 = vpack.c.bf16 %v1144_v38, %v1142_v17  ;;  %v1585_v41 = vmul.f32 %v4235_v13, %v1144_v38  ;;  %v3029_v42 = vpack.c.bf16 %v1224_v39, %v1222_v18  ;;  %v1617_v44 = vmul.f32 %v4235_v13, %v1224_v39  ;;  %v987_v45 = vpop.f32.mrf.mxu0  ;;  %v1067_v46 = vpop.f32.mrf.mxu1 }
 0x1ba   : > { %3432 = vst [vmem:[%s3999_s12 + $0x70] sm:$0xff] %v3109_v36   ;;  %v1522_v54 = vmul.f32 %v4235_v13, %v987_v45  ;;  %v1554_v55 = vmul.f32 %v4235_v13, %v1067_v46 }
 0x1bb   : > { %3448 = vst [vmem:[%s3999_s12 + $0xf0] sm:$0xff] %v3189_v37   ;;  %v1717_v47 = vadd.f32 %v4245_v43, %v1585_v41  ;;  %v1749_v49 = vadd.f32 %v4245_v43, %v1617_v44 }
 0x1bc   : > { %3401 = vst [vmem:[%s3984_s8 + $0x170] sm:$0xff] %v2949_v40   ;;  %v1654_v60 = vadd.f32 %v4245_v43, %v1522_v54  ;;  %v1686_v61 = vadd.f32 %v4245_v43, %v1554_v55 }
 0x1bd   : > { %v1845_v52 = vmax.f32 %v1717_v47, 0.0  ;;  %3417 = vst [vmem:[%s3984_s8 + $0x1f0] sm:$0xff] %v3029_v42   ;;  %v1877_v53 = vmax.f32 %v1749_v49, 0.0 }
 0x1be   : > { %v1782_v8 = vmax.f32 %v1654_v60, 0.0  ;;  %v1814_v9 = vmax.f32 %v1686_v61, 0.0 }
 0x1bf   : > { %v3269_v56 = vpack.c.bf16 %v1845_v52, %v1844_v50  ;;  %v3349_v57 = vpack.c.bf16 %v1877_v53, %v1876_v51 }
 0x1c0   : > { %v1147_v58 = vpop.f32.mrf.mxu2  ;;  %v1227_v59 = vpop.f32.mrf.mxu3 }
 0x1c1   : > { %3464 = vst [vmem:[%s3999_s12 + $0x170] sm:$0xff] %v3269_v56   ;;  %v989_v62 = vpop.f32.mrf.mxu0  ;;  %v1069_v63 = vpop.f32.mrf.mxu1  ;;  %v1586_v4 = vmul.f32 %v4235_v13, %v1147_v58  ;;  %v1618_v5 = vmul.f32 %v4235_v13, %v1227_v59 }
 0x1c2   : > { %3480 = vst [vmem:[%s3999_s12 + $0x1f0] sm:$0xff] %v3349_v57   ;;  %v2794_v0 = vpack.c.bf16 %v989_v62, %v987_v45  ;;  %v1523_v1 = vmul.f32 %v4235_v13, %v989_v62  ;;  %v2874_v2 = vpack.c.bf16 %v1069_v63, %v1067_v46  ;;  %v1555_v3 = vmul.f32 %v4235_v13, %v1069_v63 }
 0x1c3   : > { %v1718_v12 = vadd.f32 %v4245_v43, %v1586_v4  ;;  %v1750_v14 = vadd.f32 %v4245_v43, %v1618_v5 }
 0x1c4   : > { %3370 = vst [vmem:[%s3984_s8 + $0x78] sm:$0xff] %v2794_v0   ;;  %v1655_v6 = vadd.f32 %v4245_v43, %v1523_v1  ;;  %v1687_v7 = vadd.f32 %v4245_v43, %v1555_v3 }
 0x1c5   : > { %3386 = vst [vmem:[%s3984_s8 + $0xf8] sm:$0xff] %v2874_v2   ;;  %v1846_v24 = vmax.f32 %v1718_v12, 0.0  ;;  %v1878_v48 = vmax.f32 %v1750_v14, 0.0 }
 0x1c6   : > { %v1783_v10 = vmax.f32 %v1655_v6, 0.0  ;;  %v1815_v11 = vmax.f32 %v1687_v7, 0.0 }
 0x1c8   : > { %v3114_v15 = vpack.c.bf16 %v1783_v10, %v1782_v8  ;;  %v3194_v16 = vpack.c.bf16 %v1815_v11, %v1814_v9  ;;  %v1149_v17 = vpop.f32.mrf.mxu2  ;;  %v1229_v18 = vpop.f32.mrf.mxu3 }
 0x1c9   : > { %v2954_v19 = vpack.c.bf16 %v1149_v17, %v1147_v58  ;;  %v1587_v20 = vmul.f32 %v4235_v13, %v1149_v17  ;;  %v3034_v21 = vpack.c.bf16 %v1229_v18, %v1227_v59  ;;  %v1619_v22 = vmul.f32 %v4235_v13, %v1229_v18 }
 0x1ca   : > { %3433 = vst [vmem:[%s3999_s12 + $0x78] sm:$0xff] %v3114_v15  }
 0x1cb   : > { %3449 = vst [vmem:[%s3999_s12 + $0xf8] sm:$0xff] %v3194_v16   ;;  %v1719_v23 = vadd.f32 %v4245_v43, %v1587_v20  ;;  %v1751_v13 = vadd.f32 %v4245_v43, %v1619_v22 }
 0x1cc   : > { %3402 = vst [vmem:[%s3984_s8 + $0x178] sm:$0xff] %v2954_v19  }
 0x1cd   : > { %v1847_v25 = vmax.f32 %v1719_v23, 0.0  ;;  %3418 = vst [vmem:[%s3984_s8 + $0x1f8] sm:$0xff] %v3034_v21   ;;  %v1879_v26 = vmax.f32 %v1751_v13, 0.0 }
 0x1ce   : > { %3679 = shalt.err (!%p3676_p0)
}
 0x1cf   : > { %s3775_s8 = smov 64   ;;  %s3776_s27 = smov 4   ;;  %v3274_v43 = vpack.c.bf16 %v1847_v25, %v1846_v24  ;;  %v3354_v27 = vpack.c.bf16 %v1879_v26, %v1878_v48 }
 0x1d0   : > { %3512 = dma.vmem_to_hbm [thread:$0]  (%p3889_p5), %s4410_s11, 8192, %s4412_s17, %s2137_s28, %s3775_s8, %s3775_s8, %s3776_s27  }
 0x1d1   : > { %3465 = vst [vmem:[%s3999_s12 + $0x178] sm:$0xff] %v3274_v43   ;;  %s2142_s15 = scalar_lea.sflag [#allocation9], %s3912_s14  ;;  %s3694_s1 = sshra.s32 %s2176_s26, 4  ;;  %s3695_s1 = int_to_ptr.hbm [resolvable:$true] %s3694_s1 }
 0x1d2   : > { %3481 = vst [vmem:[%s3999_s12 + $0x1f8] sm:$0xff] %v3354_v27   ;;  %s3696_s23 = scalar_lea.hbm %s3695_s1, 512  ;;  %s3700_s25 = scalar_lea.hbm %s4476_s5, 1024 }
 0x1d3   : > { %p3697_p3 = scmp.ne.s32.totalorder %s3695_s1, %s3696_s23  ;;  %p3701_p2 = scmp.lt.s32.totalorder %s3695_s1, %s4476_s5 }
 0x1d4   : > { %p3702_p1 = scmp.lt.s32.totalorder %s3700_s25, %s3696_s23 }
 0x1d5   : > { %p3698_p7 = pnand %p3697_p3, %p3889_p5 }
 0x1d6   : > { %p3703_p4 = por %p3702_p1, %p3701_p2 }
 0x1d7   : > { %p3699_p9 = pneg %p3698_p7 }
 0x1d9   : > { %p3704_p8 = pnand %p3703_p4, %p3699_p9 }
 0x1db   : > { %3707 = shalt.err (!%p3704_p8)
}
 0x1dc   : > { %3513 = dma.vmem_to_hbm [thread:$0]  (%p3889_p5), %s2174_s21, 8192, %s2176_s26, %s2142_s15, %s3775_s8, %s3775_s8, %s3776_s27  }
 0x1dd PF: > { %s4495_s14 = sld [smem:[#allocation14_spill]]  ;;  %s2190_s12 = sand.u32 1, %s3750_s18  }
 0x1de   : > { %p3525_p10 = pnand %p2336_p11, %p3856_p6  ;;  %s2191_s17 = scalar_lea.sflag [#allocation4], %s2190_s12 }
 0x1e0   : > { %p3526_p12 = pneg %p3525_p10 }
 0x1e2   : > { %3741 = dma.done.wait (%p3526_p12), %s2191_s17, 8192  }
 0x1e3   : > { %3743 = vsyncadd (%p3526_p12), %s2191_s17, 4294959104  ;;  %s2201_s28 = scalar_lea.sflag [#allocation9], %s2190_s12 }
 0x1e4   : > { %3745 = dma.done.wait (%p3526_p12), %s2201_s28, 8192  }
 0x1e5   : > { %3747 = vsyncadd (%p3526_p12), %s2201_s28, 4294959104  ;;  %s26_s23 = sadd.s32 1, %s4495_s14   ;;  %s4496_s16 = sld [smem:[#allocation15_spill]] }
 0x1e6   : > { %p23_p13 = scmp.ge.s32.totalorder %s26_s23, 4   ;;  %s4497_s18 = smov %s3754_s19 }
 0x1e7   : > { %s4498_s19 = smov %s3758_s20  ;;  %s4499_s20 = smov %s3898_s30 }
 0x1e8   : > { %s4500_s21 = smov %s3766_s22  ;;  %25 = sbr.rel (!%p23_p13) target bundleno = 11 (0xb), region = 109 }
 0x1eb   : > { %s4501_s22 = smov %s4496_s16 }
 0x1ed   :  { %2207 = vsyncpa [#allocation3], 1 }
 0x1ee   :  { %2209 = vsyncpa [#allocation3 + $0x1], 1 }
 0x1ef   :  { %2210 = vsyncpa [#allocation6], 1 }
 0x1f0   :  { %2211 = vsyncpa [#allocation4], 1 }
 0x1f1   :  { %2213 = vsyncpa [#allocation4 + $0x1], 1 }
 0x1f2   :  { %2214 = vsyncpa [#allocation9], 1 }
 0x1f3   :  { %2216 = vsyncpa [#allocation9 + $0x1], 1 }

</bundles_post_ra>
